<compile_context>
chip_gen: v6e
topology: v6e:2x2x1
jax: 0.10.0
libtpu: 0.0.40
codegen_flags: <defaults>
</compile_context>

<pallas_src>
import functools

import jax
import jax.numpy as jnp
from jax import lax
from jax.experimental import pallas as pl
from jax.experimental.pallas import tpu as pltpu

# ----------------------------- config (synthetic) ----------------------------
CATEGORY_NUM = 2          # config.category_num
ANCHOR_NUM = 6            # len(config.anchor_size)
CHANNEL = 32              # use_map = use_vis = False
OUT_CH = CATEGORY_NUM * ANCHOR_NUM  # 12


# ------------------------------- Pallas kernel --------------------------------
def _head_kernel(x_ref, w1_ref, b1_ref, w2t_ref, b2_ref, o_ref, *, H, W):
    """Fused conv3x3(+folded BN)+ReLU+conv1x1 for one image.

    x_ref  : (1, H+2, W+2, C)  zero-padded NHWC input tile (compute dtype)
    w1_ref : (9*C, C1)         3x3 weights with BN scale folded in (compute dtype)
    b1_ref : (1, C1)           folded BN bias (f32)
    w2t_ref: (C2, C1)          1x1 weights, transposed (compute dtype)
    b2_ref : (C2, 1)           conv2 bias (f32)
    o_ref  : (1, C2, H*W)      channels-first output (f32), lane-dense on H*W
    """
    C = x_ref.shape[3]
    xt = x_ref[0]                                           # (H+2, W+2, C) in VMEM

    # im2col built entirely in VMEM (never round-tripped through HBM).
    cols = [xt[dy:dy + H, dx:dx + W, :] for dy in range(3) for dx in range(3)]
    col = jnp.concatenate(cols, axis=-1).reshape(H * W, 9 * C)   # (HW, 9C)

    # conv1 + folded BN + ReLU : one MXU matmul, f32 accumulation.
    h = jnp.dot(col, w1_ref[...], preferred_element_type=jnp.float32)
    h = jnp.maximum(h + b1_ref[...], 0.0)                   # (HW, C1), f32

    # conv2 (1x1), computed channels-first so the HBM store is lane-dense.
    h = h.astype(w2t_ref.dtype)
    y = jnp.einsum("oc,pc->op", w2t_ref[...], h,
                   preferred_element_type=jnp.float32)      # (C2, HW)
    o_ref[0] = (y + b2_ref[...]).astype(o_ref.dtype)


# --------------------------------- wrapper -------------------------------------
def _fold_bn(w, b, gamma, beta, mean, var, eps=1e-5):
    """Fold eval-mode BatchNorm into conv weights: BN(conv(x,w)+b) == conv(x,w*s)+b'."""
    s = gamma / jnp.sqrt(var + eps)                         # (Cout,)
    return w * s, b * s + beta - mean * s


def classification_head_forward(x_nchw, params, *, compute_dtype=jnp.bfloat16):
    """x_nchw: (N, C, H, W) f32 -> (N, category_num*anchor_num, H, W) f32."""
    N, C, H, W = x_nchw.shape
    w1f, b1f = _fold_bn(params["conv1_w"], params["conv1_b"], params["bn_gamma"],
                        params["bn_beta"], params["bn_mean"], params["bn_var"])
    C1 = w1f.shape[-1]
    C2 = params["conv2_w"].shape[-1]
    P = H * W

    w1k = w1f.reshape(9 * C, C1).astype(compute_dtype)      # (9C, C1)
    w2t = params["conv2_w"].T.astype(compute_dtype)         # (C2, C1)
    b1k = b1f.reshape(1, C1).astype(jnp.float32)
    b2k = params["conv2_b"].reshape(C2, 1).astype(jnp.float32)

    # NCHW -> NHWC (layout plumbing only) + conv zero padding, cast once to bf16.
    xp = jnp.pad(jnp.transpose(x_nchw, (0, 2, 3, 1)),
                 ((0, 0), (1, 1), (1, 1), (0, 0))).astype(compute_dtype)

    out = pl.pallas_call(
        functools.partial(_head_kernel, H=H, W=W),
        out_shape=jax.ShapeDtypeStruct((N, C2, P), jnp.float32),
        grid=(N,),
        in_specs=[
            pl.BlockSpec((1, H + 2, W + 2, C), lambda n: (n, 0, 0, 0)),
            pl.BlockSpec((9 * C, C1), lambda n: (0, 0)),
            pl.BlockSpec((1, C1), lambda n: (0, 0)),
            pl.BlockSpec((C2, C1), lambda n: (0, 0)),
            pl.BlockSpec((C2, 1), lambda n: (0, 0)),
        ],
        out_specs=pl.BlockSpec((1, C2, P), lambda n: (n, 0, 0)),
        compiler_params=pltpu.CompilerParams(
            dimension_semantics=("parallel",),
            vmem_limit_bytes=32 * 1024 * 1024,               # safe on v5e/v6e/v7x
        ),
    )(xp, w1k, b1k, w2t, b2k)

    return out.reshape(N, C2, H, W)                          # == PyTorch NCHW output


# ------------------------------- references ------------------------------------
def _ref_pytorch(x, p, eps=1e-5):
    """Exact eval-mode forward in f32, following the PyTorch op order."""
    w1 = jnp.transpose(p["conv1_w"], (3, 2, 0, 1))           # (O, I, kh, kw)
    z = lax.conv_general_dilated(x, w1, (1, 1), ((1, 1), (1, 1)),
                                 dimension_numbers=("NCHW", "OIHW", "NCHW"),
                                 precision=lax.Precision.HIGHEST)
    z = z + p["conv1_b"][None, :, None, None]
    z = ((z - p["bn_mean"][None, :, None, None])
         / jnp.sqrt(p["bn_var"] + eps)[None, :, None, None]
         * p["bn_gamma"][None, :, None, None]
         + p["bn_beta"][None, :, None, None])
    h = jnp.maximum(z, 0.0)
    y = jnp.einsum("nchw,cd->ndhw", h, p["conv2_w"],
                   precision=lax.Precision.HIGHEST)
    return y + p["conv2_b"][None, :, None, None]


def _ref_quantized(x, p, dtype, eps=1e-5):
    """Same math as the Pallas kernel (folded BN, MXU inputs cast to `dtype`,
    f32 accumulation) — isolates MXU accumulation order as the only delta."""
    q = lambda a: a.astype(dtype).astype(jnp.float32)
    w1f, b1f = _fold_bn(p["conv1_w"], p["conv1_b"], p["bn_gamma"], p["bn_beta"],
                        p["bn_mean"], p["bn_var"], eps)
    w1 = jnp.transpose(q(w1f), (3, 2, 0, 1))
    z = lax.conv_general_dilated(q(x), w1, (1, 1), ((1, 1), (1, 1)),
                                 dimension_numbers=("NCHW", "OIHW", "NCHW"),
                                 precision=lax.Precision.HIGHEST)
    h = jnp.maximum(z + b1f[None, :, None, None], 0.0)
    y = jnp.einsum("nchw,cd->ndhw", q(h), q(p["conv2_w"]),
                   precision=lax.Precision.HIGHEST)
    return y + p["conv2_b"][None, :, None, None]


# -------------------------------- parameters -----------------------------------
def init_params(key, cin=CHANNEL, cout=OUT_CH):
    ks = jax.random.split(key, 8)
    k1 = 1.0 / (9 * cin) ** 0.5
    return {
        "conv1_w": k1 * jax.random.normal(ks[0], (3, 3, cin, cin), jnp.float32),
        "conv1_b": 0.1 * jax.random.normal(ks[1], (cin,), jnp.float32),
        "bn_gamma": 1.0 + 0.1 * jax.random.normal(ks[2], (cin,), jnp.float32),
        "bn_beta": 0.1 * jax.random.normal(ks[3], (cin,), jnp.float32),
        "bn_mean": 0.1 * jax.random.normal(ks[4], (cin,), jnp.float32),
        "bn_var": 0.5 + jax.nn.softplus(jax.random.normal(ks[5], (cin,), jnp.float32)),
        "conv2_w": (1.0 / cin ** 0.5) * jax.random.normal(ks[6], (cin, cout), jnp.float32),
        "conv2_b": 0.05 * jax.random.normal(ks[7], (cout,), jnp.float32),
    }


# ----------------------------------- main ---------------------------------------
if __name__ == "__main__":
    key = jax.random.PRNGKey(0)
    kx, kp = jax.random.split(key)

    N, C, H, W = 2, CHANNEL, 16, 16
    params = init_params(kp, cin=C, cout=OUT_CH)
    x = jax.random.normal(kx, (N, C, H, W), jnp.float32)

    fwd = jax.jit(functools.partial(classification_head_forward,
                                    compute_dtype=jnp.bfloat16))
    out = jax.block_until_ready(fwd(x, params))
    assert out.shape == (N, OUT_CH, H, W), out.shape

    # Tight check: reference with identical bf16 input rounding (validates the
    # kernel's im2col / BN fold / layout exactly; only accumulation order differs).
    ref_q = _ref_quantized(x, params, jnp.bfloat16)
    err_q = float(jnp.max(jnp.abs(out - ref_q)))
    assert err_q < 2e-2, f"kernel mismatch vs quantized reference: {err_q}"

    # Loose sanity check vs the exact f32 PyTorch-order reference (bf16 drift only).
    ref_f = _ref_pytorch(x, params)
    err_f = float(jnp.max(jnp.abs(out - ref_f)))
    assert err_f < 0.25, f"kernel drifted from f32 reference: {err_f}"

    print("KERNEL_OK")
</pallas_src>

<mosaic_0001>
module attributes {stable_mosaic.version = 11 : i64} {
  func.func @_head_kernel(%arg0: i32, %arg1: memref<1x18x18x32xbf16, #tpu.memory_space<vmem>>, %arg2: memref<288x32xbf16, #tpu.memory_space<vmem>>, %arg3: memref<1x32xf32, #tpu.memory_space<vmem>>, %arg4: memref<12x32xbf16, #tpu.memory_space<vmem>>, %arg5: memref<12x1xf32, #tpu.memory_space<vmem>>, %arg6: memref<1x12x256xf32, #tpu.memory_space<vmem>>) attributes {dimension_semantics = [#tpu.dimension_semantics<parallel>], iteration_bounds = array<i64: 2>, scalar_prefetch = 0 : i64, scratch_operands = 0 : i64, tpu.core_type = #tpu.core_type<tc>, window_params = [{transform_indices = @transform_0, window_bounds = array<i64: 1, 18, 18, 32>}, {pipeline_mode = #tpu.pipeline_mode<synchronous>, transform_indices = @transform_1, window_bounds = array<i64: 288, 32>}, {pipeline_mode = #tpu.pipeline_mode<synchronous>, transform_indices = @transform_2, window_bounds = array<i64: 1, 32>}, {pipeline_mode = #tpu.pipeline_mode<synchronous>, transform_indices = @transform_3, window_bounds = array<i64: 12, 32>}, {pipeline_mode = #tpu.pipeline_mode<synchronous>, transform_indices = @transform_4, window_bounds = array<i64: 12, 1>}, {transform_indices = @transform_5, window_bounds = array<i64: 1, 12, 256>}]} {
    %c0 = arith.constant 0 : index
    %c0_0 = arith.constant 0 : index
    %c0_1 = arith.constant 0 : index
    %c0_2 = arith.constant 0 : index
    %0 = vector.load %arg1[%c0, %c0_0, %c0_1, %c0_2] : memref<1x18x18x32xbf16, #tpu.memory_space<vmem>>, vector<1x18x18x32xbf16>
    %1 = vector.shape_cast %0 : vector<1x18x18x32xbf16> to vector<18x18x32xbf16>
    %2 = vector.extract_strided_slice %1 {offsets = [0, 0, 0], sizes = [16, 16, 32], strides = [1, 1, 1]} : vector<18x18x32xbf16> to vector<16x16x32xbf16>
    %3 = vector.extract_strided_slice %1 {offsets = [0, 1, 0], sizes = [16, 16, 32], strides = [1, 1, 1]} : vector<18x18x32xbf16> to vector<16x16x32xbf16>
    %4 = vector.extract_strided_slice %1 {offsets = [0, 2, 0], sizes = [16, 16, 32], strides = [1, 1, 1]} : vector<18x18x32xbf16> to vector<16x16x32xbf16>
    %5 = vector.extract_strided_slice %1 {offsets = [1, 0, 0], sizes = [16, 16, 32], strides = [1, 1, 1]} : vector<18x18x32xbf16> to vector<16x16x32xbf16>
    %6 = vector.extract_strided_slice %1 {offsets = [1, 1, 0], sizes = [16, 16, 32], strides = [1, 1, 1]} : vector<18x18x32xbf16> to vector<16x16x32xbf16>
    %7 = vector.extract_strided_slice %1 {offsets = [1, 2, 0], sizes = [16, 16, 32], strides = [1, 1, 1]} : vector<18x18x32xbf16> to vector<16x16x32xbf16>
    %8 = vector.extract_strided_slice %1 {offsets = [2, 0, 0], sizes = [16, 16, 32], strides = [1, 1, 1]} : vector<18x18x32xbf16> to vector<16x16x32xbf16>
    %9 = vector.extract_strided_slice %1 {offsets = [2, 1, 0], sizes = [16, 16, 32], strides = [1, 1, 1]} : vector<18x18x32xbf16> to vector<16x16x32xbf16>
    %10 = vector.extract_strided_slice %1 {offsets = [2, 2, 0], sizes = [16, 16, 32], strides = [1, 1, 1]} : vector<18x18x32xbf16> to vector<16x16x32xbf16>
    %11 = tpu.concatenate %2, %3, %4, %5, %6, %7, %8, %9, %10 in 2 : vector<16x16x32xbf16>, vector<16x16x32xbf16>, vector<16x16x32xbf16>, vector<16x16x32xbf16>, vector<16x16x32xbf16>, vector<16x16x32xbf16>, vector<16x16x32xbf16>, vector<16x16x32xbf16>, vector<16x16x32xbf16> -> vector<16x16x288xbf16>
    %12 = vector.shape_cast %11 : vector<16x16x288xbf16> to vector<256x288xbf16>
    %c0_3 = arith.constant 0 : index
    %c0_4 = arith.constant 0 : index
    %13 = vector.load %arg2[%c0_3, %c0_4] : memref<288x32xbf16, #tpu.memory_space<vmem>>, vector<288x32xbf16>
    %cst = arith.constant dense<0.000000e+00> : vector<256x32xf32>
    %14 = tpu.matmul %12, %13, %cst {dimension_numbers = #tpu.dot_dimension_numbers<[1], [0], [0], [1], [0, 0, 1, 1], [], []>} : vector<256x288xbf16>, vector<288x32xbf16>, vector<256x32xf32> -> vector<256x32xf32>
    %c0_5 = arith.constant 0 : index
    %c0_6 = arith.constant 0 : index
    %15 = vector.load %arg3[%c0_5, %c0_6] : memref<1x32xf32, #tpu.memory_space<vmem>>, vector<1x32xf32>
    %16 = vector.broadcast %15 : vector<1x32xf32> to vector<256x32xf32>
    %17 = arith.addf %14, %16 : vector<256x32xf32>
    %cst_7 = arith.constant 0.000000e+00 : f32
    %18 = vector.broadcast %cst_7 : f32 to vector<256x32xf32>
    %19 = arith.maximumf %17, %18 : vector<256x32xf32>
    %20 = arith.truncf %19 : vector<256x32xf32> to vector<256x32xbf16>
    %c0_8 = arith.constant 0 : index
    %c0_9 = arith.constant 0 : index
    %21 = vector.load %arg4[%c0_8, %c0_9] : memref<12x32xbf16, #tpu.memory_space<vmem>>, vector<12x32xbf16>
    "tpu.trace_start"() <{level = 10 : i32, message = "oc,pc->op"}> : () -> ()
    %cst_10 = arith.constant dense<0.000000e+00> : vector<12x256xf32>
    %22 = tpu.matmul %21, %20, %cst_10 {dimension_numbers = #tpu.dot_dimension_numbers<[1], [1], [0], [0], [0, 0, 1, 0], [], []>} : vector<12x32xbf16>, vector<256x32xbf16>, vector<12x256xf32> -> vector<12x256xf32>
    "tpu.trace_stop"() : () -> ()
    %c0_11 = arith.constant 0 : index
    %c0_12 = arith.constant 0 : index
    %23 = vector.load %arg5[%c0_11, %c0_12] : memref<12x1xf32, #tpu.memory_space<vmem>>, vector<12x1xf32>
    %24 = vector.broadcast %23 : vector<12x1xf32> to vector<12x256xf32>
    %25 = arith.addf %22, %24 : vector<12x256xf32>
    %c0_13 = arith.constant 0 : index
    %c0_14 = arith.constant 0 : index
    %c0_15 = arith.constant 0 : index
    %26 = vector.load %arg6[%c0_13, %c0_14, %c0_15] : memref<1x12x256xf32, #tpu.memory_space<vmem>>, vector<1x12x256xf32>
    %27 = vector.shape_cast %26 : vector<1x12x256xf32> to vector<12x256xf32>
    %28 = vector.shape_cast %25 : vector<12x256xf32> to vector<1x12x256xf32>
    tpu.vector_store %arg6[%c0_13, %c0_14, %c0_15], %28 {strides = array<i32>} : memref<1x12x256xf32, #tpu.memory_space<vmem>>, vector<1x12x256xf32>,
    return
  }
  func.func @transform_0(%arg0: i32) -> (i32, i32, i32, i32) {
    %c0_i32 = arith.constant 0 : i32
    %c0_i32_0 = arith.constant 0 : i32
    %c0_i32_1 = arith.constant 0 : i32
    %c0_i32_2 = arith.constant 0 : i32
    return %arg0, %c0_i32, %c0_i32_0, %c0_i32_1 : i32, i32, i32, i32
  }
  func.func @transform_1(%arg0: i32) -> (i32, i32) {
    %c0_i32 = arith.constant 0 : i32
    %c0_i32_0 = arith.constant 0 : i32
    %c0_i32_1 = arith.constant 0 : i32
    return %c0_i32, %c0_i32_0 : i32, i32
  }
  func.func @transform_2(%arg0: i32) -> (i32, i32) {
    %c0_i32 = arith.constant 0 : i32
    %c0_i32_0 = arith.constant 0 : i32
    %c0_i32_1 = arith.constant 0 : i32
    return %c0_i32, %c0_i32_0 : i32, i32
  }
  func.func @transform_3(%arg0: i32) -> (i32, i32) {
    %c0_i32 = arith.constant 0 : i32
    %c0_i32_0 = arith.constant 0 : i32
    %c0_i32_1 = arith.constant 0 : i32
    return %c0_i32, %c0_i32_0 : i32, i32
  }
  func.func @transform_4(%arg0: i32) -> (i32, i32) {
    %c0_i32 = arith.constant 0 : i32
    %c0_i32_0 = arith.constant 0 : i32
    %c0_i32_1 = arith.constant 0 : i32
    return %c0_i32, %c0_i32_0 : i32, i32
  }
  func.func @transform_5(%arg0: i32) -> (i32, i32, i32) {
    %c0_i32 = arith.constant 0 : i32
    %c0_i32_0 = arith.constant 0 : i32
    %c0_i32_1 = arith.constant 0 : i32
    return %arg0, %c0_i32, %c0_i32_0 : i32, i32, i32
  }
}

</mosaic_0001>

<bundles_post_ra>
// kernel: classification_head_forward.1
= control target key start
LH: loop header
LB: loop body
LE: loop exit
PB: predicated region body
PF: predicated region fallthrough
CT: control target
= control target key end

     0   :  { %s2276_s18 = smov 0   ;;  %s3149_s0 = inlined_call_operand.vmem [shape: bf16[2,18,18,32], index: 0, kind: input, shape index: {}]   ;;  %s3150_s1 = inlined_call_operand.vmem [shape: bf16[288,32], index: 1, kind: input, shape index: {}]   ;;  %s3151_s2 = inlined_call_operand.vmem [shape: f32[1,32], index: 2, kind: input, shape index: {}]   ;;  %s3152_s3 = inlined_call_operand.vmem [shape: bf16[12,32], index: 3, kind: input, shape index: {}]   ;;  %s3153_s4 = inlined_call_operand.vmem [shape: f32[12,1], index: 4, kind: input, shape index: {}]   ;;  %s3154_s5 = inlined_call_operand.vmem [shape: f32[2,12,256], index: 5, kind: output, shape index: {}]  }
   0x1 LB: > { %s1872_s19 = sadd.s32 4294967295, %s2240_s18   ;;  %p1876_p0 = scmp.ge.s32.totalorder %s2240_s18, 1  ;;  %s2240_s18 = sphi %s2276_s18, %s15_s18  }
   0x2   : > { %p187_p1 = scmp.lt.s32.totalorder %s2240_s18, 3 }
   0x4   : > { %p188_p2 = pnand %p1876_p0, %p187_p1 }
   0x6   : > { %191 = sbr.rel (%p188_p2) target bundleno = 775 (0x307), region = 40 }
   0xb   : > { %p215_p3 = scmp.lt.s32.totalorder %s1872_s19, 1  ;;  %v2204_v0 = vld [vmem:[%s3150_s1 + $0x78] sm:$0xff]   ;;  %v2207_v2 = vld [vmem:[%s3150_s1 + $0x70] sm:$0xff]   ;;  %v2209_v4 = vld [vmem:[%s3150_s1 + $0x68] sm:$0xff]   ;;  %vm633_vm0 = vcmask 1046528   ;;  %s2242_s11 = smov 64  }
   0xc   : > { %2140 = vmatprep.subr.bf16.mxu1 %v2204_v0  ;;  %v2205_v1 = vld [vmem:[%s3150_s1 + $0x38] sm:$0xff]   ;;  %1956 = vmatprep.subr.bf16.mxu0 %v2204_v0  ;;  %v2208_v3 = vld [vmem:[%s3150_s1 + $0x30] sm:$0xff]   ;;  %v2210_v5 = vld [vmem:[%s3150_s1 + $0x28] sm:$0xff]   ;;  %vm408_vm1 = vsmask.f32 7424  ;;  %s2243_s12 = smov 96  }
   0xd   : > { %s3168_s19 = smov (!%p215_p3, %s1872_s19), 1  ;;  %2148 = vmatpush3.bf16.msra.mxu1 %v2205_v1  ;;  %1957 = vmatpush3.bf16.msra.mxu0 %v2205_v1  ;;  %s2244_s13 = smov 32   ;;  %vm888_vm2 = vcmask 261120   ;;  %vm921_vm3 = vcmask 523264   ;;  %vm954_vm4 = vcmask 785408  }
   0xe   : > { %s2164_s26 = smul.u32 216, %s3168_s19  ;;  %2141 = vmatprep.subr.bf16.mxu1 %v2207_v2  ;;  %1958 = vmatprep.subr.bf16.mxu0 %v2207_v2  ;;  %s1955_s25 = sshll.u32 %s3168_s19, 5 }
   0xf   : > { %s224_s28 = scalar_lea.vmem %s3154_s5, %s1955_s25 }
  0x10   : > { %s2305_s8 = scalar_lea.vmem %s3149_s0, %s2164_s26 }
  0x11   : > { %v2311_v6 = vld [vmem:[%s2305_s8 + $0xb4] sm:$0xff]   ;;  %2149 = vmatpush3.bf16.msra.mxu1 %v2208_v3  ;;  %1959 = vmatpush3.bf16.msra.mxu0 %v2208_v3  ;;  %v2319_v8 = vld [vmem:[%s2305_s8 + $0xa8] sm:$0xff]   ;;  %v2325_v10 = vld [vmem:[%s2305_s8 + $0xb0] ss:$0 sps:$4 sm:$0x11]  }
  0x12   : > { %v2314_v7 = vld [vmem:[%s2305_s8 + $0x18] sm:$0xff]   ;;  %832 = vrot.lane.b32.xlu1 %v2311_v6, %s2242_s11  ;;  %v590_v9 = vshrl.u32 %v2311_v6, 16  ;;  %2142 = vmatprep.subr.bf16.mxu1 %v2209_v4  ;;  %v676_v12 = vrot.slane %v2319_v8, 1  ;;  %v2332_v13 = vld [vmem:[%s2305_s8 + $0xc] sm:$0xff]   ;;  %v677_v14 = vrot.slane %v2325_v10, 1  ;;  %v2351_v24 = vld [vmem:[%s2305_s8] sm:$0xff]  }
  0x13   : > { %806 = vrot.lane.b32.xlu0 %v2314_v7, %s2242_s11  ;;  %v2328_v11 = vld [vmem:[%s2305_s8 + $0x9c] sm:$0xff]   ;;  %1960 = vmatprep.subr.bf16.mxu0 %v2209_v4  ;;  %v2184_v15 = vld [vmem:[%s2305_s8 + $0xa4] ss:$0 sps:$4 sm:$0x11]   ;;  %v637_v17 = vrot.slane %v2332_v13, 1  ;;  %v592_v27 = vshll.u32 %v2311_v6, 16 }
  0x14   : > { %v673_v16 = vrot.slane %v2328_v11, 1  ;;  %v2341_v18 = vsel %vm633_vm0, %v676_v12, %v677_v14  ;;  %v674_v19 = vrot.slane %v2184_v15, 1  ;;  %v2344_v20 = vld [vmem:[%s2305_s8 + $0x14] ss:$0 sps:$4 sm:$0x11]   ;;  %v566_v21 = vshrl.u32 %v2328_v11, 16 }
  0x15   : > { %2150 = vmatpush3.bf16.msra.mxu1 %v2210_v5  ;;  %1961 = vmatpush3.bf16.msra.mxu0 %v2210_v5  ;;  %v568_v22 = vshll.u32 %v2328_v11, 16  ;;  %v573_v23 = vshll.u32 %v2184_v15, 16  ;;  %v638_v26 = vrot.slane %v2344_v20, 1  ;;  %v2188_v30 = vld [vmem:[%s2305_s8 + $0x8] ss:$0 sps:$4 sm:$0x11]  }
  0x16   : > { %745 = vrot.lane.b32.xlu1 %v2319_v8, %s2243_s12  ;;  %v2354_v25 = vsel %vm633_vm0, %v673_v16, %v674_v19  ;;  %v634_v31 = vrot.slane %v2351_v24, 1  ;;  %v2189_v33 = vld [vmem:[%s2305_s8 + $0xbc] ss:$0 sps:$4 sm:$0x11]   ;;  %v594_v34 = vrot.slane %v592_v27, 1  ;;  %v635_v36 = vrot.slane %v2188_v30, 1 }
  0x17   : > { %795 = vrot.lane.b32.xlu0 %v2341_v18, %s2244_s13  ;;  %v570_v28 = vrot.slane %v568_v22, 1  ;;  %v575_v29 = vrot.slane %v573_v23, 1  ;;  %v2363_v32 = vsel %vm633_vm0, %v637_v17, %v638_v26  ;;  %v410_v37 = vshrl.u32 %v2351_v24, 16  ;;  %v2371_v42 = vld [vmem:[%s2305_s8 + $0x20] ss:$0 sps:$4 sm:$0x11]  }
  0x18   : > { %v412_v38 = vshll.u32 %v2351_v24, 16  ;;  %v595_v39 = vor.u32 %v594_v34, %v590_v9  ;;  %v597_v40 = vshll.u32 %v2189_v33, 16  ;;  %v417_v41 = vshll.u32 %v2188_v30, 16  ;;  %v2387_v56 = vld [vmem:[%s2305_s8 + $0xc0] sm:$0xff]  }
  0x19   : > { %v571_v35 = vor.u32 %v570_v28, %v566_v21  ;;  %v434_v43 = vshrl.u32 %v2314_v7, 16  ;;  %v636_v45 = vsel %vm633_vm0, %v634_v31, %v635_v36  ;;  %v436_v47 = vshll.u32 %v2314_v7, 16  ;;  %v2396_v62 = vld [vmem:[%s2305_s8 + $0xc8] ss:$0 sps:$4 sm:$0x11]   ;;  %v2429_v23 = vld [vmem:[%s2305_s8 + $0x3c] sm:$0xff]  }
  0x1a   : > { %708 = vrot.lane.b32.xlu1 %v2354_v25, %s2242_s11  ;;  %v414_v46 = vrot.slane %v412_v38, 1  ;;  %v599_v48 = vrot.slane %v597_v40, 1  ;;  %v419_v49 = vrot.slane %v417_v41, 1  ;;  %v441_v50 = vshll.u32 %v2371_v42, 16  ;;  %v2419_v17 = vld [vmem:[%s2305_s8 + $0x24] sm:$0xff]  }
  0x1b   : > { %769 = vrot.lane.b32.xlu0 %v2363_v32, %s2244_s13  ;;  %v2375_v44 = vsel %vm408_vm1, %v571_v35, %v575_v29  ;;  %v578_v51 = vshrl.u32 %v2319_v8, 16  ;;  %v438_v53 = vrot.slane %v436_v47, 1  ;;  %v580_v54 = vshll.u32 %v2319_v8, 16  ;;  %v2422_v19 = vld [vmem:[%s2305_s8 + $0x2c] ss:$0 sps:$4 sm:$0x11]  }
  0x1c   : > { %v415_v52 = vor.u32 %v414_v46, %v410_v37  ;;  %v585_v55 = vshll.u32 %v2325_v10, 16  ;;  %v2390_v57 = vsel %vm408_vm1, %v595_v39, %v599_v48  ;;  %v443_v58 = vrot.slane %v441_v50, 1  ;;  %v2436_v30 = vld [vmem:[%s2305_s8 + $0x44] ss:$0 sps:$4 sm:$0x11]   ;;  %v2439_v31 = vld [vmem:[%s2305_s8 + $0x48] sm:$0xff]  }
  0x1d   : > { %v439_v60 = vor.u32 %v438_v53, %v434_v43  ;;  %v582_v61 = vrot.slane %v580_v54, 1  ;;  %v757_v1 = vshll.u32 %v2387_v56, 16  ;;  %v679_v3 = vrot.slane %v2311_v6, 1  ;;  %v2212_v40 = vld [vmem:[%s3150_s1 + $0x60] sm:$0xff]   ;;  %v2464_v46 = vld [vmem:[%s2305_s8 + $0x54] sm:$0xff]  }
  0x1e   : > { %682 = vrot.lane.b32.xlu1 %v636_v45, %s2242_s11  ;;  %v420_v59 = vsel %vm408_vm1, %v415_v52, %v419_v49  ;;  %v587_v0 = vrot.slane %v585_v55, 1  ;;  %v680_v4 = vrot.slane %v2189_v33, 1  ;;  %v755_v5 = vshrl.u32 %v2387_v56, 16  ;;  %v2461_v45 = vld [vmem:[%s2305_s8 + $0x50] ss:$0 sps:$4 sm:$0x11]   ;;  %2143 = vmatprep.subr.bf16.mxu1 %v2212_v40 }
  0x1f   : > { %627 = vrot.lane.b32.xlu0 %v2375_v44, %s2244_s13  ;;  %v583_v63 = vor.u32 %v582_v61, %v578_v51  ;;  %v2401_v2 = vsel %vm408_vm1, %v439_v60, %v443_v58  ;;  %v759_v10 = vrot.slane %v757_v1, 1  ;;  %v762_v12 = vshll.u32 %v2396_v62, 16  ;;  %3159 = vst [vmem:[#allocation2_spill] sm:$0xff] %v2464_v46  ;;  %1962 = vmatprep.subr.bf16.mxu0 %v2212_v40  ;;  %v2473_v58 = vld [vmem:[%s2305_s8 + $0x5c] ss:$0 sps:$4 sm:$0x11]  }
  0x20   : > { %v424_v14 = vshll.u32 %v2332_v13, 16  ;;  %v2415_v15 = vsel %vm633_vm0, %v679_v3, %v680_v4  ;;  %v429_v16 = vshll.u32 %v2344_v20, 16  ;;  %v640_v21 = vrot.slane %v2314_v7, 1  ;;  %v2481_v60 = vld [vmem:[%s2305_s8 + $0xcc] sm:$0xff]   ;;  %v2213_v1 = vld [vmem:[%s3150_s1 + $0x20] sm:$0xff]   ;;  %v2216_v40 = vld [vmem:[%s3150_s1 + $0x18] sm:$0xff]  }
  0x21   : > { %v2410_v9 = vsel %vm408_vm1, %v583_v63, %v587_v0  ;;  %v641_v22 = vrot.slane %v2371_v42, 1  ;;  %v760_v26 = vor.u32 %v759_v10, %v755_v5  ;;  %v764_v27 = vrot.slane %v762_v12, 1  ;;  %3161 = vst [vmem:[#allocation4_spill] sm:$0xff] %v2481_v60  ;;  %v2215_v12 = vld [vmem:[%s3150_s1 + $0x58] sm:$0xff]   ;;  %2151 = vmatpush3.bf16.msra.mxu1 %v2213_v1  ;;  %1963 = vmatpush3.bf16.msra.mxu0 %v2213_v1 }
  0x22   : > { %879 = vrot.lane.b32.xlu1 %v2390_v57, %s2243_s12  ;;  %v422_v20 = vshrl.u32 %v2332_v13, 16  ;;  %v426_v28 = vrot.slane %v424_v14, 1  ;;  %v446_v29 = vshrl.u32 %v2419_v17, 16  ;;  %v431_v33 = vrot.slane %v429_v16, 1  ;;  %2144 = vmatprep.subr.bf16.mxu1 %v2215_v12 }
  0x23   : > { %601 = vrot.lane.b32.xlu0 %v420_v59, %s2244_s13  ;;  %v448_v34 = vshll.u32 %v2419_v17, 16  ;;  %v453_v35 = vshll.u32 %v2422_v19, 16  ;;  %v766_v36 = vrot.slane %v2387_v56, 1  ;;  %v470_v37 = vshrl.u32 %v2429_v23, 16  ;;  %v2476_v59 = vld [vmem:[%s2305_s8 + $0x60] sm:$0xff]   ;;  %1964 = vmatprep.subr.bf16.mxu0 %v2215_v12 }
  0x24   : > { %v472_v38 = vshll.u32 %v2429_v23, 16  ;;  %v477_v39 = vshll.u32 %v2436_v30, 16  ;;  %v2455_v41 = vsel %vm408_vm1, %v760_v26, %v764_v27  ;;  %v2458_v42 = vsel %vm633_vm0, %v640_v21, %v641_v22  ;;  %3160 = vst [vmem:[#allocation3_spill] sm:$0xff] %v2476_v59  ;;  %v2501_v21 = vld [vmem:[%s2305_s8 + $0xd4] ss:$0 sps:$4 sm:$0x11]  }
  0x25   : > { %v427_v43 = vor.u32 %v426_v28, %v422_v20  ;;  %v482_v49 = vshrl.u32 %v2439_v31, 16  ;;  %v484_v50 = vshll.u32 %v2439_v31, 16  ;;  %v767_v51 = vrot.slane %v2396_v62, 1  ;;  %3162 = vst [vmem:[#allocation5_spill] sm:$0xff] %v2501_v21  ;;  %2152 = vmatpush3.bf16.msra.mxu1 %v2216_v40  ;;  %1965 = vmatpush3.bf16.msra.mxu0 %v2216_v40  ;;  %v2224_v62 = vld [vmem:[%s3150_s1] sm:$0xff]  }
  0x26   : > { %719 = vrot.lane.b32.xlu1 %v2332_v13, %s2243_s12  ;;  %v474_v47 = vrot.slane %v472_v38, 1  ;;  %v479_v48 = vrot.slane %v477_v39, 1  ;;  %v489_v52 = vshll.u32 %v2461_v45, 16  ;;  %v450_v53 = vrot.slane %v448_v34, 1  ;;  %v2589_v40 = vld [vmem:[%s2305_s8 + $0x84] sm:$0xff]  }
  0x27   : > { %853 = vrot.lane.b32.xlu0 %v2401_v2, %s2243_s12  ;;  %v486_v55 = vrot.slane %v484_v50, 1  ;;  %v494_v63 = vshrl.u32 %v2464_v46, 16  ;;  %v496_v0 = vshll.u32 %v2464_v46, 16  ;;  %v2489_v3 = vsel %vm408_vm1, %v427_v43, %v431_v33  ;;  %v2510_v28 = vld [vmem:[%s2305_s8 + $0x68] ss:$0 sps:$4 sm:$0x11]  }
  0x28   : > { %v475_v54 = vor.u32 %v474_v47, %v470_v37  ;;  %v491_v61 = vrot.slane %v489_v52, 1  ;;  %v501_v10 = vshll.u32 %v2473_v58, 16  ;;  %v455_v14 = vrot.slane %v453_v35, 1  ;;  %v2537_v52 = vld [vmem:[%s2305_s8 + $0x6c] sm:$0xff]  }
  0x29   : > { %v487_v5 = vor.u32 %v486_v55, %v482_v49  ;;  %v498_v16 = vrot.slane %v496_v0, 1  ;;  %v506_v27 = vshrl.u32 %v2476_v59, 16  ;;  %v508_v33 = vshll.u32 %v2476_v59, 16  ;;  %v2218_v49 = vld [vmem:[%s3150_s1 + $0x10] sm:$0xff]   ;;  %v2220_v55 = vld [vmem:[%s3150_s1 + $0x48] sm:$0xff]  }
  0x2a   : > { %629 = vrot.lane.b32.xlu1 %v2410_v9, %s2244_s13  ;;  %v2492_v4 = vsel %vm408_vm1, %v475_v54, %v479_v48  ;;  %v503_v26 = vrot.slane %v501_v10, 1  ;;  %v451_v34 = vor.u32 %v450_v53, %v446_v29  ;;  %v844_v35 = vshll.u32 %v2481_v60, 16  ;;  %v2217_v29 = vld [vmem:[%s3150_s1 + $0x50] sm:$0xff]   ;;  %v2223_v10 = vld [vmem:[%s3150_s1 + $0x40] sm:$0xff]  }
  0x2b   : > { %797 = vrot.lane.b32.xlu0 %v2415_v15, %s2244_s13  ;;  %v2504_v22 = vsel %vm408_vm1, %v487_v5, %v491_v61  ;;  %v499_v20 = vor.u32 %v498_v16, %v494_v63  ;;  %v510_v38 = vrot.slane %v508_v33, 1  ;;  %v513_v39 = vshll.u32 %v2510_v28, 16  ;;  %2145 = vmatprep.subr.bf16.mxu1 %v2217_v29  ;;  %v2221_v61 = vld [vmem:[%s3150_s1 + $0x8] sm:$0xff]   ;;  %v2554_v0 = vld [vmem:[%s2305_s8 + $0x74] ss:$0 sps:$4 sm:$0x11]  }
  0x2c   : > { %v842_v43 = vshrl.u32 %v2481_v60, 16  ;;  %v2533_v50 = vsel %vm408_vm1, %v451_v34, %v455_v14  ;;  %v846_v53 = vrot.slane %v844_v35, 1  ;;  %1966 = vmatprep.subr.bf16.mxu0 %v2217_v29  ;;  %v518_v63 = vshrl.u32 %v2537_v52, 16  ;;  %2153 = vmatpush3.bf16.msra.mxu1 %v2218_v49  ;;  %v2569_v14 = vld [vmem:[%s2305_s8 + $0x30] sm:$0xff]  }
  0x2d   : > { %v2515_v37 = vsel %vm408_vm1, %v499_v20, %v503_v26  ;;  %v511_v47 = vor.u32 %v510_v38, %v506_v27  ;;  %v515_v48 = vrot.slane %v513_v39, 1  ;;  %v520_v1 = vshll.u32 %v2537_v52, 16  ;;  %2146 = vmatprep.subr.bf16.mxu1 %v2220_v55  ;;  %1967 = vmatpush3.bf16.msra.mxu0 %v2218_v49  ;;  %v2583_v34 = vld [vmem:[%s2305_s8 + $0x80] ss:$0 sps:$4 sm:$0x11]  }
  0x2e   : > { %710 = vrot.lane.b32.xlu1 %v2341_v18, %s2242_s11  ;;  %v2562_v5 = vsel %vm633_vm0, %v766_v36, %v767_v51  ;;  %v643_v12 = vrot.slane %v2419_v17, 1  ;;  %v525_v26 = vshll.u32 %v2554_v0, 16  ;;  %1968 = vmatprep.subr.bf16.mxu0 %v2220_v55  ;;  %v2578_v51 = vld [vmem:[%s2305_s8 + $0x78] sm:$0xff]   ;;  %v847_v27 = vor.u32 %v846_v53, %v842_v43 }
  0x2f   : > { %834 = vrot.lane.b32.xlu0 %v2387_v56, %s2242_s11  ;;  %v2540_v54 = vsel %vm408_vm1, %v511_v47, %v515_v48  ;;  %v522_v16 = vrot.slane %v520_v1, 1  ;;  %v644_v35 = vrot.slane %v2422_v19, 1  ;;  %v530_v38 = vshrl.u32 %v2578_v51, 16  ;;  %v2198_v47 = vld [vmem:[%s2305_s8 + $0x38] ss:$0 sps:$4 sm:$0x11]  }
  0x30   : > { %2154 = vmatpush3.bf16.msra.mxu1 %v2221_v61  ;;  %v527_v33 = vrot.slane %v525_v26, 1  ;;  %v532_v39 = vshll.u32 %v2578_v51, 16  ;;  %v537_v43 = vshll.u32 %v2583_v34, 16  ;;  %v2599_v48 = vld [vmem:[%s2305_s8 + $0x8c] ss:$0 sps:$4 sm:$0x11]  }
  0x31   : > { %v523_v20 = vor.u32 %v522_v16, %v518_v63  ;;  %2147 = vmatprep.subr.bf16.mxu1 %v2223_v10  ;;  %1969 = vmatpush3.bf16.msra.mxu0 %v2221_v61  ;;  %v542_v49 = vshrl.u32 %v2589_v40, 16  ;;  %v460_v55 = vshll.u32 %v2569_v14, 16  ;;  %v2608_v63 = vsel %vm633_vm0, %v643_v12, %v644_v35  ;;  %v2612_v26 = vld [vmem:[%s2305_s8 + $0x90] sm:$0xff]  }
  0x32   : > { %881 = vrot.lane.b32.xlu1 %v2455_v41, %s2243_s12  ;;  %1970 = vmatprep.subr.bf16.mxu0 %v2223_v10  ;;  %v534_v19 = vrot.slane %v532_v39, 1  ;;  %v539_v61 = vrot.slane %v537_v43, 1  ;;  %v549_v16 = vshll.u32 %v2599_v48, 16  ;;  %v554_v35 = vshrl.u32 %v2612_v26, 16 }
  0x33   : > { %771 = vrot.lane.b32.xlu0 %v2458_v42, %s2244_s13  ;;  %v2592_v29 = vsel %vm408_vm1, %v523_v20, %v527_v33  ;;  %v2615_v20 = vld [vmem:[%s2305_s8 + $0x98] ss:$0 sps:$4 sm:$0x11]   ;;  %v458_v33 = vshrl.u32 %v2569_v14, 16  ;;  %v462_v43 = vrot.slane %v460_v55, 1 }
  0x34   : > { %2155 = vmatpush3.bf16.msra.mxu1 %v2224_v62  ;;  %v535_v1 = vor.u32 %v534_v19, %v530_v38  ;;  %v556_v38 = vshll.u32 %v2612_v26, 16  ;;  %v561_v39 = vshll.u32 %v2615_v20, 16  ;;  %v465_v19 = vshll.u32 %v2198_v47, 16 }
  0x35   : > { %1971 = vmatpush3.bf16.msra.mxu0 %v2224_v62  ;;  %v551_v62 = vrot.slane %v549_v16, 1 }
  0x36   : > { %747 = vrot.lane.b32.xlu1 %v2311_v6, %s2243_s12 }
  0x37   : > { %603 = vrot.lane.b32.xlu0 %v2489_v3, %s2244_s13 }
  0x3a   : > { %684 = vrot.lane.b32.xlu1 %v2363_v32, %s2242_s11  ;;  %v849_v32 = vshll.u32 %v2501_v21, 16 }
  0x3b   : > { %808 = vrot.lane.b32.xlu0 %v2419_v17, %s2242_s11 }
  0x3c   : > { %v851_v36 = vrot.slane %v849_v32, 1  ;;  %v544_v32 = vshll.u32 %v2589_v40, 16 }
  0x3e   : > { %721 = vrot.lane.b32.xlu1 %v2314_v7, %s2243_s12  ;;  %v852_v53 = vsel %vm408_vm1, %v847_v27, %v851_v36  ;;  %v546_v10 = vrot.slane %v544_v32, 1  ;;  %v2620_v36 = vld [vmem:[%s3150_s1 + $0x88] sm:$0xff]   ;;  %v2624_v27 = vsel %vm408_vm1, %v535_v1, %v539_v61  ;;  %v463_v1 = vor.u32 %v462_v43, %v458_v33 }
  0x3f   : > { %855 = vrot.lane.b32.xlu0 %v2533_v50, %s2243_s12  ;;  %2104 = vmatprep.subr.bf16.mxu1 %v2620_v36  ;;  %v650_v33 = vrot.slane %v2436_v30, 1  ;;  %v652_v30 = vrot.slane %v2439_v31, 1  ;;  %v656_v43 = vrot.slane %v2473_v58, 1 }
  0x40   : > { %v547_v12 = vor.u32 %v546_v10, %v542_v49  ;;  %v558_v49 = vrot.slane %v556_v38, 1  ;;  %v467_v10 = vrot.slane %v465_v19, 1  ;;  %v653_v38 = vrot.slane %v2461_v45, 1 }
  0x41   : > { %v655_v45 = vrot.slane %v2464_v46, 1 }
  0x42   : > { %631 = vrot.lane.b32.xlu1 %v2390_v57, %s2244_s13  ;;  %v2634_v32 = vsel %vm408_vm1, %v547_v12, %v551_v62  ;;  %v559_v61 = vor.u32 %v558_v49, %v554_v35  ;;  %v2648_v55 = vsel %vm408_vm1, %v463_v1, %v467_v10  ;;  %v647_v12 = vrot.slane %v2198_v47, 1 }
  0x43   : > { %799 = vrot.lane.b32.xlu0 %v2562_v5, %s2244_s13  ;;  %v649_v47 = vrot.slane %v2429_v23, 1  ;;  %v2707_v19 = vsel %vm633_vm0, %v655_v45, %v656_v43 }
  0x45   : > { %v2673_v35 = vsel %vm633_vm0, %v649_v47, %v650_v33  ;;  %v661_v33 = vrot.slane %v2537_v52, 1 }
  0x46   : > { %712 = vrot.lane.b32.xlu1 %v2415_v15, %s2242_s11 }
  0x47   : > { %836 = vrot.lane.b32.xlu0 %v2481_v60, %s2242_s11 }
  0x4a   : > { %883 = vrot.lane.b32.xlu1 %v852_v53, %s2243_s12  ;;  %v563_v53 = vrot.slane %v561_v39, 1  ;;  %v2690_v39 = vsel %vm633_vm0, %v652_v30, %v653_v38  ;;  %v662_v30 = vrot.slane %v2554_v0, 1 }
  0x4b   : > { %773 = vrot.lane.b32.xlu0 %v2608_v63, %s2244_s13 }
  0x4c   : > { %v2641_v16 = vsel %vm408_vm1, %v559_v61, %v563_v53  ;;  %v658_v53 = vrot.slane %v2476_v59, 1  ;;  %v659_v61 = vrot.slane %v2510_v28, 1 }
  0x4e   : > { %749 = vrot.lane.b32.xlu1 %v2387_v56, %s2243_s12  ;;  %v646_v56 = vrot.slane %v2569_v14, 1  ;;  %v2724_v10 = vsel %vm633_vm0, %v658_v53, %v659_v61 }
  0x4f   : > { %605 = vrot.lane.b32.xlu0 %v2401_v2, %s2244_s13 }
  0x50   : > { %v2656_v62 = vsel %vm633_vm0, %v646_v56, %v647_v12 }
  0x52   : > { %686 = vrot.lane.b32.xlu1 %v2458_v42, %s2242_s11 }
  0x53   : > { %810 = vrot.lane.b32.xlu0 %v2569_v14, %s2242_s11 }
  0x56   : > { %723 = vrot.lane.b32.xlu1 %v2419_v17, %s2243_s12 }
  0x57   : > { %857 = vrot.lane.b32.xlu0 %v2648_v55, %s2243_s12 }
  0x5a   : > { %607 = vrot.lane.b32.xlu1 %v2533_v50, %s2244_s13 }
  0x5b   : > { %775 = vrot.lane.b32.xlu0 %v2656_v62, %s2244_s13 }
  0x5e   : > { %688 = vrot.lane.b32.xlu1 %v2608_v63, %s2242_s11 }
  0x5f   : > { %812 = vrot.lane.b32.xlu0 %v2429_v23, %s2242_s11 }
  0x62   : > { %725 = vrot.lane.b32.xlu1 %v2569_v14, %s2243_s12 }
  0x63   : > { %859 = vrot.lane.b32.xlu0 %v2492_v4, %s2243_s12 }
  0x66   : > { %609 = vrot.lane.b32.xlu1 %v2648_v55, %s2244_s13 }
  0x67   : > { %777 = vrot.lane.b32.xlu0 %v2673_v35, %s2244_s13 }
  0x6a   : > { %690 = vrot.lane.b32.xlu1 %v2656_v62, %s2242_s11 }
  0x6b   : > { %814 = vrot.lane.b32.xlu0 %v2439_v31, %s2242_s11 }
  0x6e   : > { %727 = vrot.lane.b32.xlu1 %v2429_v23, %s2243_s12 }
  0x6f   : > { %861 = vrot.lane.b32.xlu0 %v2504_v22, %s2243_s12 }
  0x72   : > { %611 = vrot.lane.b32.xlu1 %v2492_v4, %s2244_s13 }
  0x73   : > { %779 = vrot.lane.b32.xlu0 %v2690_v39, %s2244_s13 }
  0x76   : > { %692 = vrot.lane.b32.xlu1 %v2673_v35, %s2242_s11 }
  0x77   : > { %816 = vrot.lane.b32.xlu0 %v2464_v46, %s2242_s11 }
  0x7a   : > { %729 = vrot.lane.b32.xlu1 %v2439_v31, %s2243_s12 }
  0x7b   : > { %863 = vrot.lane.b32.xlu0 %v2515_v37, %s2243_s12 }
  0x7e   : > { %613 = vrot.lane.b32.xlu1 %v2504_v22, %s2244_s13 }
  0x7f   : > { %781 = vrot.lane.b32.xlu0 %v2707_v19, %s2244_s13 }
  0x82   : > { %694 = vrot.lane.b32.xlu1 %v2690_v39, %s2242_s11 }
  0x83   : > { %818 = vrot.lane.b32.xlu0 %v2476_v59, %s2242_s11 }
  0x84   : > { %v833_v58 = vpop.permute.xlu1 %832 }
  0x85   : > { %v807_v49 = vpop.permute.xlu0 %806 }
  0x86   : > { %731 = vrot.lane.b32.xlu1 %v2464_v46, %s2243_s12  ;;  %v2747_v46 = vsel %vm633_vm0, %v661_v33, %v662_v30 }
  0x87   : > { %865 = vrot.lane.b32.xlu0 %v2540_v54, %s2243_s12 }
  0x88   : > { %v746_v1 = vpop.permute.xlu1 %745 }
  0x89   : > { %v796_v56 = vpop.permute.xlu0 %795 }
  0x8a   : > { %615 = vrot.lane.b32.xlu1 %v2515_v37, %s2244_s13  ;;  %v1044_v38 = vsel %vm888_vm2, %v2410_v9, %v796_v56 }
  0x8b   : > { %783 = vrot.lane.b32.xlu0 %v2724_v10, %s2244_s13  ;;  %v1078_v0 = vsel %vm921_vm3, %v1044_v38, %v833_v58 }
  0x8c   : > { %v709_v12 = vpop.permute.xlu1 %708 }
  0x8d   : > { %v770_v47 = vpop.permute.xlu0 %769 }
  0x8e   : > { %696 = vrot.lane.b32.xlu1 %v2707_v19, %s2242_s11 }
  0x8f   : > { %820 = vrot.lane.b32.xlu0 %v2537_v52, %s2242_s11 }
  0x90   : > { %v683_v28 = vpop.permute.xlu1 %682 }
  0x91   : > { %v628_v45 = vpop.permute.xlu0 %627 }
  0x92   : > { %v916_v43 = vsel %vm888_vm2, %v2328_v11, %v628_v45  ;;  %733 = vrot.lane.b32.xlu1 %v2476_v59, %s2243_s12  ;;  %v2232_v45 = vld [vmem:[%s3150_s1 + $0x80] sm:$0xff]   ;;  %v1005_v59 = vsel %vm888_vm2, %v2489_v3, %v770_v47 }
  0x93   : > { %867 = vrot.lane.b32.xlu0 %v2592_v29, %s2243_s12  ;;  %v949_v53 = vsel %vm921_vm3, %v916_v43, %v709_v12  ;;  %v1052_v3 = vsel %vm921_vm3, %v1005_v59, %v807_v49 }
  0x94   : > { %v880_v61 = vpop.permute.xlu1 %879  ;;  %v995_v58 = vsel %vm954_vm4, %v949_v53, %v746_v1 }
  0x95   : > { %v602_v56 = vpop.permute.xlu0 %601  ;;  %v1123_v21 = vsel %vm954_vm4, %v1078_v0, %v880_v61 }
  0x96   : > { %v890_v60 = vsel %vm888_vm2, %v2351_v24, %v602_v56  ;;  %617 = vrot.lane.b32.xlu1 %v2540_v54, %s2244_s13  ;;  %1466 = vmatprep.mubr.bf16.mxu1 %v1123_v21 }
  0x97   : > { %785 = vrot.lane.b32.xlu0 %v2747_v46, %s2244_s13  ;;  %1467 = vmatmul.mubr.bf16.vlgmr.msra.gmra.mxu1 %v995_v58  ;;  %v923_v33 = vsel %vm921_vm3, %v890_v60, %v683_v28  ;;  %v664_v60 = vrot.slane %v2578_v51, 1  ;;  %v668_v58 = vrot.slane %v2599_v48, 1 }
  0x98   : > { %v720_v12 = vpop.permute.xlu1 %719  ;;  %2105 = vmatpush3.bf16.msra.mxu1 %v2620_v36  ;;  %v665_v36 = vrot.slane %v2583_v34, 1 }
  0x99   : > { %v854_v30 = vpop.permute.xlu0 %853  ;;  %v956_v24 = vsel %vm954_vm4, %v923_v33, %v720_v12  ;;  %2106 = vmatprep.subr.bf16.mxu1 %v2232_v45 }
  0x9a   : > { %698 = vrot.lane.b32.xlu1 %v2724_v10, %s2242_s11  ;;  %v1084_v21 = vsel %vm954_vm4, %v1052_v3, %v854_v30  ;;  %v2778_v47 = vsel %vm633_vm0, %v664_v60, %v665_v36 }
  0x9b   : > { %822 = vrot.lane.b32.xlu0 %v2578_v51, %s2242_s11  ;;  %1362 = vmatprep.mubr.bf16.mxu0 %v1084_v21 }
  0x9c   : > { %1363 = vmatmul.mubr.bf16.vlgmr.msra.gmra.mxu0 %v956_v24  ;;  %v630_v1 = vpop.permute.xlu1 %629  ;;  %2107 = vmatpush3.bf16.msra.mxu1 %v2232_v45  ;;  %v667_v45 = vrot.slane %v2589_v40, 1 }
  0x9d   : > { %v798_v59 = vpop.permute.xlu0 %797  ;;  %v918_v0 = vsel %vm888_vm2, %v2319_v8, %v630_v1 }
  0x9e   : > { %735 = vrot.lane.b32.xlu1 %v2537_v52, %s2243_s12  ;;  %v1047_v38 = vsel %vm888_vm2, %v2390_v57, %v798_v59  ;;  %v2803_v3 = vsel %vm633_vm0, %v667_v45, %v668_v58 }
  0x9f   : > { %869 = vrot.lane.b32.xlu0 %v2624_v27, %s2243_s12 }
  0xa0   : > { %v711_v49 = vpop.permute.xlu1 %710 }
  0xa1   : > { %v835_v28 = vpop.permute.xlu0 %834  ;;  %v951_v57 = vsel %vm921_vm3, %v918_v0, %v711_v49 }
  0xa2   : > { %619 = vrot.lane.b32.xlu1 %v2592_v29, %s2244_s13  ;;  %v1080_v34 = vsel %vm921_vm3, %v1047_v38, %v835_v28  ;;  %v671_v38 = vrot.slane %v2615_v20, 1 }
  0xa3   : > { %787 = vrot.lane.b32.xlu0 %v2778_v47, %s2244_s13 }
  0xa4   : > { %v882_v43 = vpop.permute.xlu1 %881 }
  0xa5   : > { %v772_v53 = vpop.permute.xlu0 %771  ;;  %v1126_v61 = vsel %vm954_vm4, %v1080_v34, %v882_v43 }
  0xa6   : > { %700 = vrot.lane.b32.xlu1 %v2747_v46, %s2242_s11  ;;  %1474 = vmatprep.mubr.bf16.mxu1 %v1126_v61  ;;  %v1008_v21 = vsel %vm888_vm2, %v2401_v2, %v772_v53  ;;  %v670_v2 = vrot.slane %v2612_v26, 1 }
  0xa7   : > { %824 = vrot.lane.b32.xlu0 %v2589_v40, %s2242_s11 }
  0xa8   : > { %v748_v56 = vpop.permute.xlu1 %747  ;;  %v2828_v53 = vsel %vm633_vm0, %v670_v2, %v671_v38 }
  0xa9   : > { %v604_v12 = vpop.permute.xlu0 %603  ;;  %v998_v33 = vsel %vm954_vm4, %v951_v57, %v748_v56 }
  0xaa   : > { %737 = vrot.lane.b32.xlu1 %v2578_v51, %s2243_s12  ;;  %1475 = vmatmul.mubr.bf16.gmra.mxu1 %v998_v33  ;;  %v892_v48 = vsel %vm888_vm2, %v2332_v13, %v604_v12 }
  0xab   : > { %871 = vrot.lane.b32.xlu0 %v2634_v32, %s2243_s12 }
  0xac   : > { %v685_v30 = vpop.permute.xlu1 %684 }
  0xad   : > { %v809_v24 = vpop.permute.xlu0 %808  ;;  %v925_v1 = vsel %vm921_vm3, %v892_v48, %v685_v30 }
  0xae   : > { %621 = vrot.lane.b32.xlu1 %v2624_v27, %s2244_s13  ;;  %v1054_v36 = vsel %vm921_vm3, %v1008_v21, %v809_v24 }
  0xaf   : > { %789 = vrot.lane.b32.xlu0 %v2803_v3, %s2244_s13 }
  0xb0   : > { %v722_v60 = vpop.permute.xlu1 %721 }
  0xb1   : > { %v856_v59 = vpop.permute.xlu0 %855  ;;  %v959_v49 = vsel %vm954_vm4, %v925_v1, %v722_v60 }
  0xb2   : > { %702 = vrot.lane.b32.xlu1 %v2778_v47, %s2242_s11  ;;  %v1087_v28 = vsel %vm954_vm4, %v1054_v36, %v856_v59 }
  0xb3   : > { %826 = vrot.lane.b32.xlu0 %v2612_v26, %s2242_s11  ;;  %1370 = vmatprep.mubr.bf16.mxu0 %v1087_v28 }
  0xb4   : > { %1371 = vmatmul.mubr.bf16.gmra.mxu0 %v959_v49  ;;  %v632_v13 = vpop.permute.xlu1 %631 }
  0xb5   : > { %v800_v34 = vpop.permute.xlu0 %799  ;;  %v920_v58 = vsel %vm888_vm2, %v2311_v6, %v632_v13 }
  0xb6   : > { %739 = vrot.lane.b32.xlu1 %v2589_v40, %s2243_s12  ;;  %v1050_v0 = vsel %vm888_vm2, %v2455_v41, %v800_v34 }
  0xb7   : > { %873 = vrot.lane.b32.xlu0 %v2641_v16, %s2243_s12 }
  0xb8   : > { %v713_v43 = vpop.permute.xlu1 %712 }
  0xb9   : > { %v837_v61 = vpop.permute.xlu0 %836  ;;  %v953_v41 = vsel %vm921_vm3, %v920_v58, %v713_v43 }
  0xba   : > { %623 = vrot.lane.b32.xlu1 %v2634_v32, %s2244_s13  ;;  %v1082_v20 = vsel %vm921_vm3, %v1050_v0, %v837_v61 }
  0xbb   : > { %791 = vrot.lane.b32.xlu0 %v2828_v53, %s2244_s13 }
  0xbc   : > { %v884_v57 = vpop.permute.xlu1 %883 }
  0xbd   : > { %v774_v56 = vpop.permute.xlu0 %773  ;;  %v1129_v45 = vsel %vm954_vm4, %v1082_v20, %v884_v57 }
  0xbe   : > { %704 = vrot.lane.b32.xlu1 %v2803_v3, %s2242_s11  ;;  %1482 = vmatprep.mubr.bf16.mxu1 %v1129_v45  ;;  %v1011_v21 = vsel %vm888_vm2, %v2533_v50, %v774_v56 }
  0xbf   : > { %828 = vrot.lane.b32.xlu0 %v2328_v11, %s2242_s11 }
  0xc0   : > { %v750_v12 = vpop.permute.xlu1 %749 }
  0xc1   : > { %v606_v33 = vpop.permute.xlu0 %605  ;;  %v1001_v30 = vsel %vm954_vm4, %v953_v41, %v750_v12 }
  0xc2   : > { %741 = vrot.lane.b32.xlu1 %v2612_v26, %s2243_s12  ;;  %1483 = vmatmul.mubr.bf16.gmra.mxu1 %v1001_v30  ;;  %v894_v48 = vsel %vm888_vm2, %v2314_v7, %v606_v33 }
  0xc3   : > { %875 = vrot.lane.b32.xlu0 %v2375_v44, %s2243_s12  ;;  %2108 = vmatprep.mubr.msk.bf16.mxu1 %vm888_vm2, %v2458_v42 }
  0xc4   : > { %v687_v6 = vpop.permute.xlu1 %686 }
  0xc5   : > { %v811_v24 = vpop.permute.xlu0 %810  ;;  %v927_v1 = vsel %vm921_vm3, %v894_v48, %v687_v6 }
  0xc6   : > { %625 = vrot.lane.b32.xlu1 %v2641_v16, %s2244_s13  ;;  %v1056_v36 = vsel %vm921_vm3, %v1011_v21, %v811_v24 }
  0xc7   : > { %793 = vrot.lane.b32.xlu0 %v2354_v25, %s2244_s13 }
  0xc8   : > { %v724_v60 = vpop.permute.xlu1 %723 }
  0xc9   : > { %v858_v42 = vpop.permute.xlu0 %857  ;;  %v962_v59 = vsel %vm954_vm4, %v927_v1, %v724_v60 }
  0xca   : > { %706 = vrot.lane.b32.xlu1 %v2828_v53, %s2242_s11  ;;  %v1090_v49 = vsel %vm954_vm4, %v1056_v36, %v858_v42  ;;  %2109 = vmatmul.mubr.msk.bf16.vlgmr.msra.gmra.mxu1 %vm888_vm2, %v2608_v63 }
  0xcb   : > { %830 = vrot.lane.b32.xlu0 %v2319_v8, %s2242_s11  ;;  %1378 = vmatprep.mubr.bf16.mxu0 %v1090_v49 }
  0xcc   : > { %1379 = vmatmul.mubr.bf16.gmra.mxu0 %v962_v59  ;;  %v608_v7 = vpop.permute.xlu1 %607  ;;  %2112 = vmatprep.mubr.msk.bf16.mxu1 %vm888_vm2, %v2656_v62 }
  0xcd   : > { %v776_v50 = vpop.permute.xlu0 %775  ;;  %v896_v8 = vsel %vm888_vm2, %v2419_v17, %v608_v7 }
  0xce   : > { %743 = vrot.lane.b32.xlu1 %v2328_v11, %s2243_s12  ;;  %v1014_v63 = vsel %vm888_vm2, %v2648_v55, %v776_v50 }
  0xcf   : > { %877 = vrot.lane.b32.xlu0 %v2410_v9, %s2243_s12 }
  0xd0   : > { %v689_v28 = vpop.permute.xlu1 %688 }
  0xd1   : > { %v813_v13 = vpop.permute.xlu0 %812  ;;  %v929_v62 = vsel %vm921_vm3, %v896_v8, %v689_v28 }
  0xd2   : > { %2113 = vmatmul.mubr.msk.bf16.gmra.mxu1 %vm888_vm2, %v2673_v35  ;;  %v1058_v2 = vsel %vm921_vm3, %v1014_v63, %v813_v13  ;;  %v3165_v63 = vld [vmem:[#allocation2_spill] sm:$0xff] }
  0xd3   : > { %2116 = vmatprep.mubr.msk.bf16.mxu1 %vm888_vm2, %v2690_v39 }
  0xd4   : > { %v726_v11 = vpop.permute.xlu1 %725 }
  0xd5   : > { %v860_v9 = vpop.permute.xlu0 %859  ;;  %v965_v38 = vsel %vm954_vm4, %v929_v62, %v726_v11 }
  0xd6   : > { %v1093_v34 = vsel %vm954_vm4, %v1058_v2, %v860_v9 }
  0xd7   : > { %1386 = vmatprep.mubr.bf16.mxu0 %v1093_v34 }
  0xd8   : > { %1387 = vmatmul.mubr.bf16.gmra.mxu0 %v965_v38  ;;  %v610_v35 = vpop.permute.xlu1 %609 }
  0xd9   : > { %v778_v17 = vpop.permute.xlu0 %777  ;;  %v898_v43 = vsel %vm888_vm2, %v2569_v14, %v610_v35 }
  0xda   : > { %2117 = vmatmul.mubr.msk.bf16.gmra.mxu1 %vm888_vm2, %v2707_v19  ;;  %v1017_v61 = vsel %vm888_vm2, %v2492_v4, %v778_v17 }
  0xdb   : > { %2120 = vmatprep.mubr.msk.bf16.mxu1 %vm888_vm2, %v2724_v10 }
  0xdc   : > { %v691_v55 = vpop.permute.xlu1 %690 }
  0xdd   : > { %v815_v39 = vpop.permute.xlu0 %814  ;;  %v931_v0 = vsel %vm921_vm3, %v898_v43, %v691_v55  ;;  %v3166_v43 = vld [vmem:[#allocation3_spill] sm:$0xff] }
  0xde   : > { %v1060_v57 = vsel %vm921_vm3, %v1017_v61, %v815_v39 }
  0xe0   : > { %v728_v20 = vpop.permute.xlu1 %727 }
  0xe1   : > { %v862_v56 = vpop.permute.xlu0 %861  ;;  %v968_v45 = vsel %vm954_vm4, %v931_v0, %v728_v20 }
  0xe2   : > { %v1096_v19 = vsel %vm954_vm4, %v1060_v57, %v862_v56  ;;  %2121 = vmatmul.mubr.msk.bf16.gmra.mxu1 %vm888_vm2, %v2747_v46 }
  0xe3   : > { %1394 = vmatprep.mubr.bf16.mxu0 %v1096_v19  ;;  %2124 = vmatprep.mubr.msk.bf16.mxu1 %vm888_vm2, %v2778_v47 }
  0xe4   : > { %1395 = vmatmul.mubr.bf16.gmra.mxu0 %v968_v45  ;;  %v612_v14 = vpop.permute.xlu1 %611 }
  0xe5   : > { %v780_v4 = vpop.permute.xlu0 %779  ;;  %v900_v41 = vsel %vm888_vm2, %v2429_v23, %v612_v14 }
  0xe6   : > { %v1020_v46 = vsel %vm888_vm2, %v2504_v22, %v780_v4 }
  0xe8   : > { %v693_v10 = vpop.permute.xlu1 %692 }
  0xe9   : > { %v817_v58 = vpop.permute.xlu0 %816  ;;  %v933_v12 = vsel %vm921_vm3, %v900_v41, %v693_v10 }
  0xea   : > { %2125 = vmatmul.mubr.msk.bf16.gmra.mxu1 %vm888_vm2, %v2803_v3  ;;  %v1062_v33 = vsel %vm921_vm3, %v1020_v46, %v817_v58 }
  0xeb   : > { %2128 = vmatprep.mubr.msk.bf16.mxu1 %vm888_vm2, %v2828_v53 }
  0xec   : > { %v730_v47 = vpop.permute.xlu1 %729 }
  0xed   : > { %v864_v30 = vpop.permute.xlu0 %863  ;;  %v971_v6 = vsel %vm954_vm4, %v933_v12, %v730_v47 }
  0xee   : > { %v1099_v24 = vsel %vm954_vm4, %v1062_v33, %v864_v30 }
  0xef   : > { %1402 = vmatprep.mubr.bf16.mxu0 %v1099_v24 }
  0xf0   : > { %1403 = vmatmul.mubr.bf16.gmra.mxu0 %v971_v6  ;;  %v614_v3 = vpop.permute.xlu1 %613 }
  0xf1   : > { %v782_v23 = vpop.permute.xlu0 %781  ;;  %v902_v48 = vsel %vm888_vm2, %v2439_v31, %v614_v3 }
  0xf2   : > { %2129 = vmatmul.mubr.msk.bf16.gmra.mxu1 %vm888_vm2, %v2354_v25  ;;  %v1023_v21 = vsel %vm888_vm2, %v2515_v37, %v782_v23  ;;  %v3164_v37 = vld [vmem:[#allocation5_spill] sm:$0xff] }
  0xf3   : > { %2132 = vmatprep.mubr.msk.bf16.mxu1 %vm888_vm2, %v2341_v18  ;;  %v3163_v18 = vld [vmem:[#allocation4_spill] sm:$0xff]  ;;  %v886_v49 = vrot.slane %v3164_v37, 1 }
  0xf4   : > { %v695_v22 = vpop.permute.xlu1 %694  ;;  %v885_v31 = vrot.slane %v3163_v18, 1 }
  0xf5   : > { %v819_v53 = vpop.permute.xlu0 %818  ;;  %v935_v1 = vsel %vm921_vm3, %v902_v48, %v695_v22 }
  0xf6   : > { %v1064_v36 = vsel %vm921_vm3, %v1023_v21, %v819_v53  ;;  %v887_v28 = vsel %vm633_vm0, %v885_v31, %v886_v49 }
  0xf8   : > { %v732_v60 = vpop.permute.xlu1 %731 }
  0xf9   : > { %v866_v42 = vpop.permute.xlu0 %865  ;;  %v974_v59 = vsel %vm954_vm4, %v935_v1, %v732_v60 }
  0xfa   : > { %v1102_v25 = vsel %vm954_vm4, %v1064_v36, %v866_v42  ;;  %2133 = vmatmul.mubr.msk.bf16.gmra.mxu1 %vm888_vm2, %v2415_v15 }
  0xfb   : > { %1410 = vmatprep.mubr.bf16.mxu0 %v1102_v25  ;;  %2136 = vmatprep.mubr.msk.bf16.mxu1 %vm888_vm2, %v2562_v5 }
  0xfc   : > { %1411 = vmatmul.mubr.bf16.gmra.mxu0 %v974_v59  ;;  %v616_v7 = vpop.permute.xlu1 %615 }
  0xfd   : > { %v784_v50 = vpop.permute.xlu0 %783  ;;  %v904_v15 = vsel %vm888_vm2, %v3165_v63, %v616_v7 }
  0xfe   : > { %v1026_v62 = vsel %vm888_vm2, %v2540_v54, %v784_v50 }
 0x100   : > { %v697_v13 = vpop.permute.xlu1 %696 }
 0x101   : > { %v821_v8 = vpop.permute.xlu0 %820  ;;  %v937_v5 = vsel %vm921_vm3, %v904_v15, %v697_v13 }
 0x102   : > { %2137 = vmatmul.mubr.msk.bf16.gmra.mxu1 %vm888_vm2, %v887_v28  ;;  %v1066_v2 = vsel %vm921_vm3, %v1026_v62, %v821_v8 }
 0x104   : > { %v734_v11 = vpop.permute.xlu1 %733 }
 0x105   : > { %v868_v9 = vpop.permute.xlu0 %867  ;;  %v977_v38 = vsel %vm954_vm4, %v937_v5, %v734_v11 }
 0x106   : > { %v1105_v34 = vsel %vm954_vm4, %v1066_v2, %v868_v9 }
 0x107   : > { %1418 = vmatprep.mubr.bf16.mxu0 %v1105_v34 }
 0x108   : > { %1419 = vmatmul.mubr.bf16.gmra.mxu0 %v977_v38  ;;  %v618_v35 = vpop.permute.xlu1 %617 }
 0x109   : > { %v786_v17 = vpop.permute.xlu0 %785  ;;  %v906_v61 = vsel %vm888_vm2, %v3166_v43, %v618_v35 }
 0x10a   : > { %v1029_v54 = vsel %vm888_vm2, %v2592_v29, %v786_v17 }
 0x10c   : > { %v699_v55 = vpop.permute.xlu1 %698 }
 0x10d   : > { %v823_v39 = vpop.permute.xlu0 %822  ;;  %v939_v0 = vsel %vm921_vm3, %v906_v61, %v699_v55 }
 0x10e   : > { %v1068_v57 = vsel %vm921_vm3, %v1029_v54, %v823_v39 }
 0x110   : > { %v736_v20 = vpop.permute.xlu1 %735 }
 0x111   : > { %v870_v56 = vpop.permute.xlu0 %869  ;;  %v980_v45 = vsel %vm954_vm4, %v939_v0, %v736_v20 }
 0x112   : > { %v1108_v19 = vsel %vm954_vm4, %v1068_v57, %v870_v56 }
 0x113   : > { %1426 = vmatprep.mubr.bf16.mxu0 %v1108_v19 }
 0x114   : > { %1427 = vmatmul.mubr.bf16.gmra.mxu0 %v980_v45  ;;  %v620_v14 = vpop.permute.xlu1 %619 }
 0x115   : > { %v788_v4 = vpop.permute.xlu0 %787  ;;  %v908_v41 = vsel %vm888_vm2, %v2537_v52, %v620_v14 }
 0x116   : > { %v1032_v29 = vsel %vm888_vm2, %v2624_v27, %v788_v4 }
 0x118   : > { %v701_v10 = vpop.permute.xlu1 %700 }
 0x119   : > { %v825_v58 = vpop.permute.xlu0 %824  ;;  %v941_v46 = vsel %vm921_vm3, %v908_v41, %v701_v10 }
 0x11a   : > { %v1070_v47 = vsel %vm921_vm3, %v1032_v29, %v825_v58 }
 0x11c   : > { %v738_v12 = vpop.permute.xlu1 %737 }
 0x11d   : > { %v872_v33 = vpop.permute.xlu0 %871  ;;  %v983_v30 = vsel %vm954_vm4, %v941_v46, %v738_v12 }
 0x11e   : > { %v1111_v6 = vsel %vm954_vm4, %v1070_v47, %v872_v33 }
 0x11f   : > { %1434 = vmatprep.mubr.bf16.mxu0 %v1111_v6 }
 0x120   : > { %1435 = vmatmul.mubr.bf16.gmra.mxu0 %v983_v30  ;;  %v622_v24 = vpop.permute.xlu1 %621 }
 0x121   : > { %v790_v3 = vpop.permute.xlu0 %789  ;;  %v910_v52 = vsel %vm888_vm2, %v2578_v51, %v622_v24  ;;  %v3003_v24 = vld [vmem:[%s3151_s2] ss:$0 sm:$0xff] }
 0x122   : > { %v1035_v27 = vsel %vm888_vm2, %v2634_v32, %v790_v3 }
 0x124   : > { %v703_v23 = vpop.permute.xlu1 %702 }
 0x125   : > { %v827_v22 = vpop.permute.xlu0 %826  ;;  %v943_v53 = vsel %vm921_vm3, %v910_v52, %v703_v23 }
 0x126   : > { %v1072_v21 = vsel %vm921_vm3, %v1035_v27, %v827_v22 }
 0x128   : > { %v740_v48 = vpop.permute.xlu1 %739 }
 0x129   : > { %v874_v1 = vpop.permute.xlu0 %873  ;;  %v986_v60 = vsel %vm954_vm4, %v943_v53, %v740_v48 }
 0x12a   : > { %v1114_v36 = vsel %vm954_vm4, %v1072_v21, %v874_v1 }
 0x12b   : > { %1442 = vmatprep.mubr.bf16.mxu0 %v1114_v36 }
 0x12c   : > { %1443 = vmatmul.mubr.bf16.gmra.mxu0 %v986_v60  ;;  %v624_v42 = vpop.permute.xlu1 %623 }
 0x12d   : > { %v792_v59 = vpop.permute.xlu0 %791  ;;  %v912_v51 = vsel %vm888_vm2, %v2589_v40, %v624_v42 }
 0x12e   : > { %v1038_v32 = vsel %vm888_vm2, %v2641_v16, %v792_v59 }
 0x130   : > { %v705_v25 = vpop.permute.xlu1 %704 }
 0x131   : > { %v829_v18 = vpop.permute.xlu0 %828  ;;  %v945_v31 = vsel %vm921_vm3, %v912_v51, %v705_v25 }
 0x132   : > { %v1074_v49 = vsel %vm921_vm3, %v1038_v32, %v829_v18 }
 0x134   : > { %v742_v37 = vpop.permute.xlu1 %741 }
 0x135   : > { %v876_v7 = vpop.permute.xlu0 %875  ;;  %v989_v50 = vsel %vm954_vm4, %v945_v31, %v742_v37 }
 0x136   : > { %v1117_v28 = vsel %vm954_vm4, %v1074_v49, %v876_v7 }
 0x137   : > { %1450 = vmatprep.mubr.bf16.mxu0 %v1117_v28 }
 0x138   : > { %1451 = vmatmul.mubr.bf16.gmra.mxu0 %v989_v50  ;;  %v626_v13 = vpop.permute.xlu1 %625 }
 0x139   : > { %v794_v8 = vpop.permute.xlu0 %793  ;;  %v914_v40 = vsel %vm888_vm2, %v2612_v26, %v626_v13 }
 0x13a   : > { %v1041_v16 = vsel %vm888_vm2, %v2375_v44, %v794_v8 }
 0x13c   : > { %v707_v63 = vpop.permute.xlu1 %706 }
 0x13d   : > { %v831_v15 = vpop.permute.xlu0 %830  ;;  %v947_v62 = vsel %vm921_vm3, %v914_v40, %v707_v63 }
 0x13e   : > { %v1076_v11 = vsel %vm921_vm3, %v1041_v16, %v831_v15 }
 0x140   : > { %v744_v5 = vpop.permute.xlu1 %743 }
 0x141   : > { %v878_v2 = vpop.permute.xlu0 %877  ;;  %v992_v9 = vsel %vm954_vm4, %v947_v62, %v744_v5 }
 0x142   : > { %v1120_v38 = vsel %vm954_vm4, %v1076_v11, %v878_v2 }
 0x143   : > { %1458 = vmatprep.mubr.bf16.mxu0 %v1120_v38 }
 0x144   : > { %1459 = vmatmul.mubr.bf16.gmra.mxu0 %v992_v9 }
 0x157   : > { %v2050_v34 = vpop.f32.mrf.mxu1 }
 0x159   : > { %v2051_v35 = vpop.f32.mrf.mxu1 }
 0x15a   : > { %v2984_v17 = vadd.f32 %v2051_v35, %v2050_v34 }
 0x15b   : > { %v2053_v26 = vpop.f32.mrf.mxu1 }
 0x15c   : > { %v1972_v55 = vpop.f32.mrf.mxu0 }
 0x15d   : > { %v2054_v39 = vpop.f32.mrf.mxu1 }
 0x15e   : > { %v1973_v44 = vpop.f32.mrf.mxu0  ;;  %v2986_v43 = vadd.f32 %v2054_v39, %v2053_v26 }
 0x15f   : > { %v1974_v61 = vadd.f32 %v1973_v44, %v1972_v55 }
 0x160   : > { %v1975_v54 = vpop.f32.mrf.mxu0 }
 0x161   : > { %v1365_v52 = vadd.f32 %v1974_v61, %v3003_v24 }
 0x162   : > { %v1976_v0 = vpop.f32.mrf.mxu0 }
 0x163   : > { %v1977_v20 = vadd.f32 %v1976_v0, %v1975_v54 }
 0x165   : > { %v1368_v59 = vadd.f32 %v1977_v20, %v3003_v24 }
 0x16a   : > { %v2056_v57 = vpop.f32.mrf.mxu1 }
 0x16c   : > { %v2057_v56 = vpop.f32.mrf.mxu1 }
 0x16d   : > { %v2988_v45 = vadd.f32 %v2057_v56, %v2056_v57 }
 0x16e   : > { %v2059_v19 = vpop.f32.mrf.mxu1 }
 0x170   : > { %v2060_v14 = vpop.f32.mrf.mxu1 }
 0x171   : > { %v2990_v4 = vadd.f32 %v2060_v14, %v2059_v19 }
 0x174   : > { %v1978_v10 = vpop.f32.mrf.mxu0 }
 0x176   : > { %v1979_v58 = vpop.f32.mrf.mxu0 }
 0x177   : > { %v1980_v41 = vadd.f32 %v1979_v58, %v1978_v10 }
 0x178   : > { %v1981_v29 = vpop.f32.mrf.mxu0 }
 0x179   : > { %v1373_v3 = vadd.f32 %v1980_v41, %v3003_v24 }
 0x17a   : > { %v1982_v46 = vpop.f32.mrf.mxu0 }
 0x17b   : > { %v1983_v12 = vadd.f32 %v1982_v46, %v1981_v29 }
 0x17d   : > { %v1376_v21 = vadd.f32 %v1983_v12, %v3003_v24 }
 0x182   : > { %v2992_v47 = vpop.f32.mrf.mxu1 }
 0x184   : > { %v2994_v33 = vpop.f32.mrf.mxu1 }
 0x186   : > { %v2996_v30 = vpop.f32.mrf.mxu1 }
 0x188   : > { %v2998_v6 = vpop.f32.mrf.mxu1 }
 0x18a   : > { %v2110_v23 = vpop.f32.mrf.mxu1 }
 0x18b   : > { %v1534_v22 = vadd.f32 %v2110_v23, %v1373_v3 }
 0x18c   : > { %v1984_v27 = vpop.f32.mrf.mxu0  ;;  %v1525_v53 = vpop.f32.mrf.mxu1 }
 0x18d   : > { %v1526_v48 = vadd.f32 %v1525_v53, %v1365_v52  ;;  %v1654_v51 = vmax.f32 %v1534_v22, 0.0 }
 0x18e   : > { %v1985_v1 = vpop.f32.mrf.mxu0  ;;  %v2111_v60 = vpop.f32.mrf.mxu1 }
 0x18f   : > { %v1986_v36 = vadd.f32 %v1985_v1, %v1984_v27  ;;  %v1537_v42 = vadd.f32 %v2111_v60, %v1376_v21  ;;  %v1652_v37 = vmax.f32 %v1526_v48, 0.0 }
 0x190   : > { %v1987_v25 = vpop.f32.mrf.mxu0  ;;  %v1528_v18 = vpop.f32.mrf.mxu1 }
 0x191   : > { %v1655_v32 = vmax.f32 %v1537_v42, 0.0  ;;  %v1529_v31 = vadd.f32 %v1528_v18, %v1368_v59  ;;  %v1381_v8 = vadd.f32 %v1986_v36, %v3003_v24 }
 0x192   : > { %v1988_v49 = vpop.f32.mrf.mxu0  ;;  %v2114_v7 = vpop.f32.mrf.mxu1 }
 0x193   : > { %v3009_v50 = vpack.c.bf16 %v1655_v32, %v1654_v51  ;;  %v1653_v28 = vmax.f32 %v1529_v31, 0.0  ;;  %v1989_v13 = vadd.f32 %v1988_v49, %v1987_v25 }
 0x194   : > { %v1541_v63 = vpop.f32.mrf.mxu1 }
 0x195   : > { %v3012_v15 = vpack.c.bf16 %v1653_v28, %v1652_v37  ;;  %v1542_v40 = vadd.f32 %v1541_v63, %v1381_v8  ;;  %v1384_v62 = vadd.f32 %v1989_v13, %v3003_v24 }
 0x196   : > { %v2115_v16 = vpop.f32.mrf.mxu1 }
 0x197   : > { %v1656_v34 = vmax.f32 %v1542_v40, 0.0 }
 0x198   : > { %v1990_v5 = vpop.f32.mrf.mxu0  ;;  %v1544_v11 = vpop.f32.mrf.mxu1 }
 0x199   : > { %v1545_v2 = vadd.f32 %v1544_v11, %v1384_v62  ;;  %v3051_v62 = vld [vmem:[%s3152_s3] sm:$0x3f]  }
 0x19a   : > { %v1991_v9 = vpop.f32.mrf.mxu0  ;;  %v2118_v38 = vpop.f32.mrf.mxu1  ;;  %2102 = vmatprep.mubr.msk.bf16.mxu1 %vm888_vm2, %v3051_v62 }
 0x19b   : > { %v1657_v35 = vmax.f32 %v1545_v2, 0.0  ;;  %v1992_v26 = vadd.f32 %v1991_v9, %v1990_v5 }
 0x19c   : > { %v1993_v55 = vpop.f32.mrf.mxu0  ;;  %v1557_v39 = vpop.f32.mrf.mxu1 }
 0x19d   : > { %v3015_v44 = vpack.c.bf16 %v1657_v35, %v1656_v34  ;;  %v1389_v61 = vadd.f32 %v1992_v26, %v3003_v24  ;;  %v1469_v26 = vadd.f32 %v2984_v17, %v3003_v24  ;;  %v2245_v17 = vmov 0  }
 0x19e   : > { %v1994_v54 = vpop.f32.mrf.mxu0  ;;  %v2119_v0 = vpop.f32.mrf.mxu1  ;;  %2177 = vset.pattern.permute.xlu0 %v2245_v17  ;;  %2178 = vset.pattern.permute.xlu1 %v2245_v17 }
 0x19f   : > { %v1550_v20 = vadd.f32 %v2114_v7, %v1389_v61  ;;  %v1995_v57 = vadd.f32 %v1994_v54, %v1993_v55  ;;  %v1472_v61 = vadd.f32 %v2986_v43, %v3003_v24 }
 0x1a0   : > { %v1560_v56 = vpop.f32.mrf.mxu1 }
 0x1a1   : > { %v1392_v19 = vadd.f32 %v1995_v57, %v3003_v24  ;;  %v1658_v29 = vmax.f32 %v1550_v20, 0.0 }
 0x1a2   : > { %v3019_v14 = vpop.f32.mrf.mxu1 }
 0x1a3   : > { %v1553_v10 = vadd.f32 %v2115_v16, %v1392_v19 }
 0x1a4   : > { %v1996_v58 = vpop.f32.mrf.mxu0  ;;  %v3021_v41 = vpop.f32.mrf.mxu1 }
 0x1a5   : > { %v1659_v46 = vmax.f32 %v1553_v10, 0.0  ;;  %v2064_v10 = vadd.f32 %v2994_v33, %v2992_v47  ;;  %v1477_v33 = vadd.f32 %v2988_v45, %v3003_v24 }
 0x1a6   : > { %v1997_v12 = vpop.f32.mrf.mxu0  ;;  %v3023_v3 = vpop.f32.mrf.mxu1 }
 0x1a7   : > { %v1998_v23 = vadd.f32 %v1997_v12, %v1996_v58  ;;  %v3025_v22 = vpack.c.bf16 %v1659_v46, %v1658_v29  ;;  %v2067_v46 = vadd.f32 %v2998_v6, %v2996_v30  ;;  %v1480_v30 = vadd.f32 %v2990_v4, %v3003_v24 }
 0x1a8   : > { %v1999_v52 = vpop.f32.mrf.mxu0  ;;  %v3027_v27 = vpop.f32.mrf.mxu1 }
 0x1a9   : > { %v1397_v53 = vadd.f32 %v1998_v23, %v3003_v24 }
 0x1aa   : > { %v2000_v48 = vpop.f32.mrf.mxu0  ;;  %v3030_v21 = vpop.f32.mrf.mxu1 }
 0x1ab   : > { %v1558_v1 = vadd.f32 %v1557_v39, %v1397_v53  ;;  %v2001_v60 = vadd.f32 %v2000_v48, %v1999_v52 }
 0x1ac   : > { %v3032_v36 = vpop.f32.mrf.mxu1 }
 0x1ad   : > { %v1400_v42 = vadd.f32 %v2001_v60, %v3003_v24  ;;  %v1660_v32 = vmax.f32 %v1558_v1, 0.0  ;;  %v1485_v1 = vadd.f32 %v2064_v10, %v3003_v24 }
 0x1ae   : > { %v3035_v59 = vpop.f32.mrf.mxu1 }
 0x1af   : > { %v1561_v25 = vadd.f32 %v1560_v56, %v1400_v42  ;;  %v1488_v42 = vadd.f32 %v2067_v46, %v3003_v24 }
 0x1b0   : > { %v2002_v18 = vpop.f32.mrf.mxu0  ;;  %v3037_v51 = vpop.f32.mrf.mxu1 }
 0x1b1   : > { %v1661_v31 = vmax.f32 %v1561_v25, 0.0 }
 0x1b2   : > { %v2003_v37 = vpop.f32.mrf.mxu0  ;;  %v3039_v49 = vpop.f32.mrf.mxu1 }
 0x1b3   : > { %v2004_v7 = vadd.f32 %v2003_v37, %v2002_v18  ;;  %v3041_v28 = vpack.c.bf16 %v1661_v31, %v1660_v32 }
 0x1b4   : > { %v2005_v13 = vpop.f32.mrf.mxu0  ;;  %v3043_v8 = vpop.f32.mrf.mxu1 }
 0x1b5   : > { %v1405_v63 = vadd.f32 %v2004_v7, %v3003_v24 }
 0x1b6   : > { %v2006_v40 = vpop.f32.mrf.mxu0  ;;  %v3046_v16 = vpop.f32.mrf.mxu1 }
 0x1b7   : > { %v2007_v5 = vadd.f32 %v2006_v40, %v2005_v13  ;;  %v1566_v2 = vadd.f32 %v2118_v38, %v1405_v63  ;;  %v1702_v38 = vld [vmem:[%s3153_s4] sm:$0xff] }
 0x1b8   : > { %v3053_v11 = vpop.f32.mrf.mxu1  ;;  %1706 = vperm.xlu0 %2177, %v1702_v38  }
 0x1b9   : > { %v1408_v9 = vadd.f32 %v2007_v5, %v3003_v24  ;;  %v1662_v54 = vmax.f32 %v1566_v2, 0.0 }
 0x1ba   : > { %v2134_v34 = vpop.f32.mrf.mxu1 }
 0x1bb   : > { %v1569_v35 = vadd.f32 %v2119_v0, %v1408_v9  ;;  %v1630_v57 = vadd.f32 %v2134_v34, %v1469_v26  ;;  %v1703_v0 = vld [vmem:[%s3153_s4 + $0x8] sm:$0xf] }
 0x1bc   : > { %v2008_v55 = vpop.f32.mrf.mxu0  ;;  %v3060_v39 = vpop.f32.mrf.mxu1  ;;  %1711 = vperm.xlu1 %2178, %v1703_v0  }
 0x1bd   : > { %v1663_v20 = vmax.f32 %v1569_v35, 0.0  ;;  %v1678_v12 = vmax.f32 %v1630_v57, 0.0 }
 0x1be   : > { %v2009_v56 = vpop.f32.mrf.mxu0  ;;  %v2135_v19 = vpop.f32.mrf.mxu1 }
 0x1bf   : > { %v1633_v43 = vadd.f32 %v2135_v19, %v1472_v61  ;;  %v3072_v58 = vpack.c.bf16 %v1663_v20, %v1662_v54  ;;  %v2010_v20 = vadd.f32 %v2009_v56, %v2008_v55 }
 0x1c0   : > { %v3074_v29 = vpop.f32.mrf.mxu1  ;;  %v2011_v52 = vpop.f32.mrf.mxu0 }
 0x1c1   : > { %v1679_v23 = vmax.f32 %v1633_v43, 0.0  ;;  %v1413_v19 = vadd.f32 %v2010_v20, %v3003_v24 }
 0x1c2   : > { %v2138_v53 = vpop.f32.mrf.mxu1  ;;  %v2012_v25 = vpop.f32.mrf.mxu0 }
 0x1c3   : > { %v3078_v48 = vpack.c.bf16 %v1679_v23, %v1678_v12  ;;  %v1646_v47 = vadd.f32 %v2138_v53, %v1485_v1  ;;  %v2013_v35 = vadd.f32 %v2012_v25, %v2011_v52  ;;  %v1574_v52 = vadd.f32 %v3021_v41, %v1413_v19 }
 0x1c4   : > { %v1637_v60 = vpop.f32.mrf.mxu1 }
 0x1c5   : > { %v1638_v32 = vadd.f32 %v1637_v60, %v1477_v33  ;;  %v1682_v7 = vmax.f32 %v1646_v47, 0.0  ;;  %v1416_v57 = vadd.f32 %v2013_v35, %v3003_v24  ;;  %v1664_v33 = vmax.f32 %v1574_v52, 0.0 }
 0x1c6   : > { %v2139_v18 = vpop.f32.mrf.mxu1 }
 0x1c7   : > { %v1649_v31 = vadd.f32 %v2139_v18, %v1488_v42  ;;  %v1680_v5 = vmax.f32 %v1638_v32, 0.0  ;;  %v1577_v43 = vadd.f32 %v3027_v27, %v1416_v57 }
 0x1c8   : > { %v2014_v6 = vpop.f32.mrf.mxu0  ;;  %v1640_v37 = vpop.f32.mrf.mxu1 }
 0x1c9   : > { %v1683_v13 = vmax.f32 %v1649_v31, 0.0  ;;  %v1641_v63 = vadd.f32 %v1640_v37, %v1480_v30  ;;  %v1665_v1 = vmax.f32 %v1577_v43, 0.0 }
 0x1ca   : > { %v2015_v40 = vpop.f32.mrf.mxu0 }
 0x1cb   : > { %v1699_v2 = vpack.c.bf16 %v1683_v13, %v1682_v7  ;;  %v1681_v9 = vmax.f32 %v1641_v63, 0.0  ;;  %v2016_v34 = vadd.f32 %v2015_v40, %v2014_v6  ;;  %v1690_v25 = vpack.c.bf16 %v1665_v1, %v1664_v33 }
 0x1cc   : > { %v2017_v45 = vpop.f32.mrf.mxu0 }
 0x1cd   : > { %v1698_v26 = vpack.c.bf16 %v1681_v9, %v1680_v5  ;;  %v1421_v61 = vadd.f32 %v2016_v34, %v3003_v24  ;;  %2156 = vmatprep.subr.msk.bf16.mxu1 %vm888_vm2, %v1699_v2  ;;  %v1741_v30 = vsel %vm888_vm2, %v1690_v25, 0  ;;  %v1738_v2 = vsel %vm888_vm2, %v3072_v58, 0 }
 0x1ce   : > { %v2018_v54 = vpop.f32.mrf.mxu0 }
 0x1cf   : > { %v2019_v4 = vadd.f32 %v2018_v54, %v2017_v45  ;;  %v1582_v38 = vadd.f32 %v3019_v14, %v1421_v61 }
 0x1d1   : > { %v1424_v0 = vadd.f32 %v2019_v4, %v3003_v24  ;;  %v1666_v46 = vmax.f32 %v1582_v38, 0.0 }
 0x1d3   : > { %v1585_v17 = vadd.f32 %v3023_v3, %v1424_v0 }
 0x1d4   : > { %v2020_v10 = vpop.f32.mrf.mxu0 }
 0x1d5   : > { %v1667_v12 = vmax.f32 %v1585_v17, 0.0 }
 0x1d6   : > { %v2021_v23 = vpop.f32.mrf.mxu0 }
 0x1d7   : > { %v2022_v55 = vadd.f32 %v2021_v23, %v2020_v10  ;;  %v1691_v56 = vpack.c.bf16 %v1667_v12, %v1666_v46 }
 0x1d8   : > { %v2023_v53 = vpop.f32.mrf.mxu0 }
 0x1d9   : > { %v1429_v14 = vadd.f32 %v2022_v55, %v3003_v24  ;;  %v1744_v60 = vsel %vm888_vm2, %v1691_v56, 0 }
 0x1da   : > { %v2024_v47 = vpop.f32.mrf.mxu0  ;;  %2087 = vmatpush3.bf16.xpose.msra.mxu1 %v1744_v60 }
 0x1db   : > { %v1590_v3 = vadd.f32 %v3032_v36, %v1429_v14  ;;  %v2025_v42 = vadd.f32 %v2024_v47, %v2023_v53  ;;  %2157 = vmatprep.subr.msk.bf16.mxu1 %vm888_vm2, %v1698_v26 }
 0x1dd   : > { %v1432_v27 = vadd.f32 %v2025_v42, %v3003_v24  ;;  %v1668_v32 = vmax.f32 %v1590_v3, 0.0 }
 0x1df   : > { %v1593_v41 = vadd.f32 %v3037_v51, %v1432_v27 }
 0x1e0   : > { %v2026_v18 = vpop.f32.mrf.mxu0 }
 0x1e1   : > { %v1669_v31 = vmax.f32 %v1593_v41, 0.0 }
 0x1e2   : > { %v2027_v6 = vpop.f32.mrf.mxu0  ;;  %2089 = vmatpush3.bf16.xpose.msra.mxu1 %v1741_v30 }
 0x1e3   : > { %v3102_v37 = vpack.c.bf16 %v1669_v31, %v1668_v32  ;;  %v2028_v7 = vadd.f32 %v2027_v6, %v2026_v18  ;;  %2158 = vmatprep.subr.msk.bf16.mxu1 %vm888_vm2, %v3078_v48 }
 0x1e4   : > { %v2029_v36 = vpop.f32.mrf.mxu0 }
 0x1e5   : > { %v1437_v13 = vadd.f32 %v2028_v7, %v3003_v24 }
 0x1e6   : > { %v2030_v63 = vpop.f32.mrf.mxu0 }
 0x1e7   : > { %v2031_v40 = vadd.f32 %v2030_v63, %v2029_v36  ;;  %v1598_v51 = vadd.f32 %v3030_v21, %v1437_v13 }
 0x1e9   : > { %v1440_v5 = vadd.f32 %v2031_v40, %v3003_v24  ;;  %v1670_v45 = vmax.f32 %v1598_v51, 0.0 }
 0x1ea   : > { %2091 = vmatpush3.bf16.xpose.msra.mxu1 %v1738_v2 }
 0x1eb   : > { %v1601_v9 = vadd.f32 %v3035_v59, %v1440_v5 }
 0x1ec   : > { %v2032_v34 = vpop.f32.mrf.mxu0 }
 0x1ed   : > { %v1671_v35 = vmax.f32 %v1601_v9, 0.0 }
 0x1ee   : > { %v2033_v26 = vpop.f32.mrf.mxu0 }
 0x1ef   : > { %v1693_v48 = vpack.c.bf16 %v1671_v35, %v1670_v45  ;;  %v2034_v61 = vadd.f32 %v2033_v26, %v2032_v34 }
 0x1f0   : > { %v2035_v54 = vpop.f32.mrf.mxu0 }
 0x1f1   : > { %v1445_v20 = vadd.f32 %v2034_v61, %v3003_v24 }
 0x1f2   : > { %v2036_v4 = vpop.f32.mrf.mxu0 }
 0x1f3   : > { %v2037_v57 = vadd.f32 %v2036_v4, %v2035_v54  ;;  %v1606_v21 = vadd.f32 %v3043_v8, %v1445_v20 }
 0x1f5   : > { %v1448_v38 = vadd.f32 %v2037_v57, %v3003_v24  ;;  %v1672_v19 = vmax.f32 %v1606_v21, 0.0 }
 0x1f7   : > { %v1609_v58 = vadd.f32 %v3053_v11, %v1448_v38 }
 0x1f8   : > { %v2038_v0 = vpop.f32.mrf.mxu0 }
 0x1f9   : > { %v1673_v59 = vmax.f32 %v1609_v58, 0.0 }
 0x1fa   : > { %v2039_v17 = vpop.f32.mrf.mxu0 }
 0x1fb   : > { %v1694_v10 = vpack.c.bf16 %v1673_v59, %v1672_v19  ;;  %v2040_v55 = vadd.f32 %v2039_v17, %v2038_v0 }
 0x1fc   : > { %v2041_v43 = vpop.f32.mrf.mxu0 }
 0x1fd   : > { %v1453_v11 = vadd.f32 %v2040_v55, %v3003_v24 }
 0x1fe   : > { %v2042_v46 = vpop.f32.mrf.mxu0 }
 0x1ff   : > { %v2043_v23 = vadd.f32 %v2042_v46, %v2041_v43  ;;  %v1614_v42 = vadd.f32 %v3039_v49, %v1453_v11  ;;  %v1729_v49 = vsel %vm888_vm2, %v3015_v44, 0 }
 0x201   : > { %v1456_v1 = vadd.f32 %v2043_v23, %v3003_v24  ;;  %v1674_v32 = vmax.f32 %v1614_v42, 0.0 }
 0x203   : > { %v1617_v47 = vadd.f32 %v3046_v16, %v1456_v1  ;;  %v1735_v16 = vsel %vm888_vm2, %v3041_v28, 0  ;;  %v1723_v28 = vsel %vm888_vm2, %v3012_v15, 0 }
 0x204   : > { %v2044_v12 = vpop.f32.mrf.mxu0 }
 0x205   : > { %v1675_v25 = vmax.f32 %v1617_v47, 0.0 }
 0x206   : > { %v2045_v52 = vpop.f32.mrf.mxu0 }
 0x207   : > { %v2046_v56 = vadd.f32 %v2045_v52, %v2044_v12  ;;  %v1695_v30 = vpack.c.bf16 %v1675_v25, %v1674_v32 }
 0x208   : > { %v2047_v53 = vpop.f32.mrf.mxu0 }
 0x209   : > { %v1461_v8 = vadd.f32 %v2046_v56, %v3003_v24 }
 0x20a   : > { %v2048_v14 = vpop.f32.mrf.mxu0 }
 0x20b   : > { %v2049_v60 = vadd.f32 %v2048_v14, %v2047_v53  ;;  %v1622_v33 = vadd.f32 %v3060_v39, %v1461_v8  ;;  %v1726_v39 = vsel %vm888_vm2, %v3009_v50, 0 }
 0x20d   : > { %v1464_v3 = vadd.f32 %v2049_v60, %v3003_v24  ;;  %v1676_v41 = vmax.f32 %v1622_v33, 0.0  ;;  %v1732_v24 = vsel %vm888_vm2, %v3025_v22, 0 }
 0x20f   : > { %v1625_v27 = vadd.f32 %v3074_v29, %v1464_v3 }
 0x211   : > { %v1677_v18 = vmax.f32 %v1625_v27, 0.0 }
 0x213   : > { %v1696_v31 = vpack.c.bf16 %v1677_v18, %v1676_v41 }
 0x215   : > { %2159 = vmatprep.subr.msk.bf16.mxu1 %vm888_vm2, %v1696_v31 }
 0x216   : > { %2093 = vmatpush3.bf16.xpose.msra.mxu1 %v1735_v16 }
 0x217   : > { %2160 = vmatprep.subr.msk.bf16.mxu1 %vm888_vm2, %v1695_v30 }
 0x21e   : > { %2095 = vmatpush3.bf16.xpose.msra.mxu1 %v1732_v24 }
 0x21f   : > { %2161 = vmatprep.subr.msk.bf16.mxu1 %vm888_vm2, %v1694_v10 }
 0x226   : > { %2097 = vmatpush3.bf16.xpose.msra.mxu1 %v1729_v49 }
 0x227   : > { %2162 = vmatprep.subr.msk.bf16.mxu1 %vm888_vm2, %v1693_v48 }
 0x22e   : > { %2099 = vmatpush3.bf16.xpose.msra.mxu1 %v1726_v39 }
 0x22f   : > { %2163 = vmatprep.subr.msk.bf16.mxu1 %vm888_vm2, %v3102_v37 }
 0x233   : > { %v1707_v22 = vpop.permute.xlu0 %1706 }
 0x236   : > { %2101 = vmatpush3.bf16.xpose.msra.mxu1 %v1723_v28 }
 0x237   : > { %v1712_v6 = vpop.permute.xlu1 %1711 }
 0x23d   : > { %2103 = vmatmul.mubr.msk.bf16.vlgmr.msra.gmra.mxu1 %vm888_vm2, %v3051_v62 }
 0x2fd   : > { %v1804_v44 = vpop.f32.mrf.mxu1 }
 0x2fe   : > { %v1805_v29 = vadd.f32 %v1804_v44, %v1707_v22 }
 0x2ff   : > { %v1806_v50 = vpop.f32.mrf.mxu1 }
 0x300   : > { %1813 = vst [vmem:[%s224_s28] sm:$0xff] %v1805_v29  ;;  %v1807_v7 = vadd.f32 %v1806_v50, %v1707_v22 }
 0x301   : > { %v1808_v37 = vpop.f32.mrf.mxu1 }
 0x302   : > { %1814 = vst [vmem:[%s224_s28 + $0x8] sm:$0xff] %v1807_v7  ;;  %v1809_v36 = vadd.f32 %v1808_v37, %v1712_v6 }
 0x303   : > { %v1810_v15 = vpop.f32.mrf.mxu1 }
 0x304   : > { %1815 = vst [vmem:[%s224_s28 + $0x10] sm:$0xf] %v1809_v36  ;;  %v1811_v13 = vadd.f32 %v1810_v15, %v1712_v6 }
 0x306   : > { %1816 = vst [vmem:[%s224_s28 + $0x18] sm:$0xf] %v1811_v13 }
 0x307 PF: > { %s15_s18 = sadd.s32 1, %s2240_s18  }
 0x308   : > { %p12_p4 = scmp.ge.s32.totalorder %s15_s18, 4  }
 0x30a   :  { %14 = sbr.rel (!%p12_p4) target bundleno = 1 (0x1), region = 70 }

</bundles_post_ra>
